<compile_context>
chip_gen: v7x
topology: tpu7x:2x2x1
jax: 0.10.0
libtpu: 0.0.40
codegen_flags: <defaults>
</compile_context>

<pallas_src>
import functools
import math

import jax
import jax.numpy as jnp
from jax import lax
from jax.experimental import pallas as pl
from jax.experimental.pallas import tpu as pltpu


def _vmem_limit_bytes():
    """Per-generation scoped-VMEM limit: leave ~32 MiB headroom, cap at 96 MiB."""
    try:
        cap = pltpu.get_tpu_info().vmem_capacity_bytes
    except Exception:
        cap = 128 * 1024 * 1024
    return int(max(32 << 20, min(cap - (32 << 20), 96 << 20)))


def _pick_tile(n, max_tile):
    """Largest multiple of 128 that divides n and is <= max_tile; else full n."""
    best = None
    t = 128
    while t <= min(n, max_tile):
        if n % t == 0:
            best = t
        t += 128
    return best if best is not None else n


# --------------------------- K1: LN + QKV + l2norm ---------------------------

def _ln_qkv_l2norm_kernel(x_ref, gamma_ref, beta_ref, w_ref, o_ref, *, heads, dim_head):
    # x: (1, C, TL) f32; gamma/beta: (1, C, 1) f32; w: (3*inner, C) bf16
    # o: (1, 3*inner, TL) bf16  -- q/k head groups l2-normalized, v untouched.
    x = x_ref[0]                                                 # (C, TL)
    mean = jnp.mean(x, axis=0, keepdims=True)                    # channel mean
    var = jnp.mean((x - mean) ** 2, axis=0, keepdims=True)       # unbiased=False
    inv_std = pl.reciprocal(jnp.sqrt(var) + 1e-6, approx=True)   # /(sqrt(var)+eps)
    normed = gamma_ref[0] * (x - mean) * inv_std + beta_ref[0]   # (C, TL) f32

    # 1x1 conv == matmul over channels (bf16 MXU operands, f32 accumulate).
    qkv = lax.dot_general(w_ref[...], normed.astype(w_ref.dtype),
                          (((1,), (0,)), ((), ())),
                          preferred_element_type=jnp.float32)    # (3*inner, TL) f32

    tl = qkv.shape[-1]
    two_inner = 2 * heads * dim_head
    # per-head l2norm of q and k: t / (||t||_d + 1e-6), per position.
    qk = qkv[:two_inner, :].reshape(2 * heads, dim_head, tl)     # row regroup (d % 8 == 0)
    sumsq = jnp.sum(qk * qk, axis=1, keepdims=True)              # (2H, 1, TL)
    inv_norm = pl.reciprocal(jnp.sqrt(sumsq) + 1e-6, approx=True)
    qk_n = (qk * inv_norm).reshape(two_inner, tl)

    o_ref[0, :two_inner] = qk_n.astype(o_ref.dtype)
    o_ref[0, two_inner:] = qkv[two_inner:, :].astype(o_ref.dtype)


# --------------------- K2: attention + output projection ---------------------

def _attn_proj_kernel(q_ref, k_ref, v_ref, w_ref, b_ref, o_ref, stage_ref,
                      *, dim_head, kv_all_heads):
    # q: (1, heads, d, TQ) bf16 (resident across heads); k/v: (1, heads|1, d, Lk) bf16;
    # w: (out_dim, inner) bf16 (resident); b: (out_dim, 1) f32;
    # o: (1, out_dim, TQ) f32; stage: (inner, TQ) bf16 VMEM scratch.
    h = pl.program_id(2)
    hk = h if kv_all_heads else 0                                # trace-time switch

    q = q_ref[0, h]                                              # (d, TQ)
    k = k_ref[0, hk]                                             # (d, Lk)
    v = v_ref[0, hk]                                             # (d, Lk)

    # sim[i, j] = sum_d q[d, i] * k[d, j]   (contract d on both -> MXU)
    sim = lax.dot_general(q, k, (((0,), (0,)), ((), ())),
                          preferred_element_type=jnp.float32)    # (TQ, Lk) f32
    # q/k are l2-normalized -> sim in [-1, 1]; exp() is safe without the row-max
    # shift (softmax is shift-invariant, result identical).
    p = jnp.exp(sim)
    denom = jnp.sum(p, axis=-1, keepdims=True)
    attn = (p * pl.reciprocal(denom, approx=True)).astype(v.dtype)  # dropout(p=0) == id

    # out_h^T[d, i] = sum_j v[d, j] * attn[i, j]
    out_t = lax.dot_general(v, attn, (((1,), (1,)), ((), ())),
                            preferred_element_type=jnp.float32)  # (d, TQ) f32

    # Stage this head's result at its channel offset; the output projection is done
    # ONCE at the last head at full contraction depth (inner = heads * dim_head).
    row = pl.multiple_of(h * dim_head, dim_head)
    stage_ref[pl.ds(row, dim_head), :] = out_t.astype(stage_ref.dtype)

    @pl.when(h == pl.num_programs(2) - 1)
    def _():
        o_ref[0] = (lax.dot_general(w_ref[...], stage_ref[...],
                                    (((1,), (0,)), ((), ())),
                                    preferred_element_type=jnp.float32)
                    + b_ref[...]).astype(o_ref.dtype)


# --------------------------------- wrapper -----------------------------------

def dpsa1d_forward(x_ncl, params, *, heads, dim_head, length_top_k=-1):
    """x_ncl: (b, dim, L) float32 (PyTorch NCL). Returns (b, out_dim, L) float32."""
    b, c, L = x_ncl.shape
    inner = heads * dim_head
    assert dim_head % 8 == 0, "dim_head (=out_dim) must be a multiple of 8"
    top_k = length_top_k if length_top_k > 0 else int(math.isqrt(L))
    need_select = top_k < L
    vmem_limit = _vmem_limit_bytes()

    x = x_ncl.astype(jnp.float32)
    gamma = params["gamma"].reshape(1, c, 1).astype(jnp.float32)
    beta = params["beta"].reshape(1, c, 1).astype(jnp.float32)
    w_qkv = params["w_qkv"].reshape(3 * inner, c).astype(jnp.bfloat16)  # conv layout
    w_out = params["w_out"].reshape(-1, inner)                          # (out_dim, inner)
    out_dim = w_out.shape[0]
    w_out_b = w_out.astype(jnp.bfloat16)                                # unsplit -> deep matmul
    b_out = params["b_out"].reshape(out_dim, 1).astype(jnp.float32)

    # ---- K1: layernorm + qkv projection + per-head l2norm (L-tiled) ----
    per_col_k1 = (8 * c            # x block, f32, double-buffered
                  + 4 * c          # normed temp, f32
                  + 12 * inner     # qkv temp, f32
                  + 12 * inner)    # out block, bf16, double-buffered
    tl_cap = max(128, min(2048, (vmem_limit // 2) // max(per_col_k1, 1)))
    TL = _pick_tile(L, tl_cap)
    qkvn = pl.pallas_call(
        functools.partial(_ln_qkv_l2norm_kernel, heads=heads, dim_head=dim_head),
        out_shape=jax.ShapeDtypeStruct((b, 3 * inner, L), jnp.bfloat16),
        grid=(b, L // TL),
        in_specs=[
            pl.BlockSpec((1, c, TL), lambda i, j: (i, 0, j)),
            pl.BlockSpec((1, c, 1), lambda i, j: (0, 0, 0)),
            pl.BlockSpec((1, c, 1), lambda i, j: (0, 0, 0)),
            pl.BlockSpec((3 * inner, c), lambda i, j: (0, 0)),   # resident weight
        ],
        out_specs=pl.BlockSpec((1, 3 * inner, TL), lambda i, j: (i, 0, j)),
        compiler_params=pltpu.CompilerParams(
            dimension_semantics=("parallel", "parallel"),
            vmem_limit_bytes=vmem_limit),
    )(x, gamma, beta, w_qkv)

    # free reshape: channels -> (3*heads, dim_head)   (no HBM movement, NCL layout)
    qkv_g = qkvn.reshape(b, 3 * heads, dim_head, L)

    if need_select:
        # probe score + top-k + gather: data-dependent, stays in plain JAX.
        qn_g = qkv_g[:, :heads]
        kn_g = qkv_g[:, heads:2 * heads]
        v_g = qkv_g[:, 2 * heads:]
        q_probe = jnp.sum(jnp.abs(qn_g.astype(jnp.float32)), axis=3)        # (b, H, d)
        score = jnp.einsum("bhd,bhdl->bhl", q_probe,
                           jnp.abs(kn_g.astype(jnp.float32)))               # (b, H, L)
        _, top_idx = lax.top_k(score, top_k)                                # (b, H, top_k)
        gidx = jnp.broadcast_to(top_idx[:, :, None, :],
                                (b, heads, dim_head, top_k))
        k_in = jnp.take_along_axis(kn_g, gidx, axis=3)                      # (b, H, d, top_k)
        v_in = jnp.take_along_axis(v_g, gidx, axis=3)
        Lk = top_k
    else:
        # no pruning: read k/v straight out of the fused qkv tensor via index_map.
        k_in = qkv_g
        v_in = qkv_g
        Lk = L

    # ---- K2 tiling / residency budget (per-generation VMEM aware) ----
    kv_resident_bytes = 2 * 2 * (heads * dim_head * Lk * 2)  # K+V, bf16, double-buffered
    kv_resident = kv_resident_bytes <= vmem_limit // 3
    kv_block_heads = heads if kv_resident else 1
    kv_bytes = kv_resident_bytes if kv_resident else 2 * 2 * (dim_head * Lk * 2)

    per_col_k2 = (10 * Lk                  # sim (f32) + p (f32) + attn (bf16)
                  + 4 * heads * dim_head   # q block, bf16, double-buffered
                  + 2 * inner              # staging scratch, bf16
                  + 8 * out_dim)           # output block, f32, double-buffered
    tq_cap = max(128, min(2048, (vmem_limit // 2 - kv_bytes) // max(per_col_k2, 1)))
    TQ = _pick_tile(L, tq_cap)
    # TODO(synk): for very long unpruned Lk where even TQ=128 exceeds the VMEM budget,
    #             switch K2 to an Lk-tiled flash-style online-softmax inner loop.
    while b * (L // TQ) < 2 and TQ % 256 == 0:   # keep both v7x TensorCores busy
        TQ //= 2

    if need_select:
        k_map = (lambda i, j, h: (i, 0, 0, 0)) if kv_resident else (lambda i, j, h: (i, h, 0, 0))
        v_map = k_map
    else:
        if kv_resident:
            k_map = lambda i, j, h: (i, 1, 0, 0)
            v_map = lambda i, j, h: (i, 2, 0, 0)
        else:
            k_map = lambda i, j, h: (i, heads + h, 0, 0)
            v_map = lambda i, j, h: (i, 2 * heads + h, 0, 0)

    # ---- K2: attention + output projection (head axis = reduction) ----
    out = pl.pallas_call(
        functools.partial(_attn_proj_kernel, dim_head=dim_head,
                          kv_all_heads=kv_resident),
        out_shape=jax.ShapeDtypeStruct((b, out_dim, L), jnp.float32),
        grid=(b, L // TQ, heads),
        in_specs=[
            pl.BlockSpec((1, heads, dim_head, TQ), lambda i, j, h: (i, 0, 0, j)),
            pl.BlockSpec((1, kv_block_heads, dim_head, Lk), k_map),
            pl.BlockSpec((1, kv_block_heads, dim_head, Lk), v_map),
            pl.BlockSpec((out_dim, inner), lambda i, j, h: (0, 0)),   # resident weight
            pl.BlockSpec((out_dim, 1), lambda i, j, h: (0, 0)),
        ],
        out_specs=pl.BlockSpec((1, out_dim, TQ), lambda i, j, h: (i, 0, j)),
        scratch_shapes=[pltpu.VMEM((inner, TQ), jnp.bfloat16)],
        compiler_params=pltpu.CompilerParams(
            dimension_semantics=("parallel", "parallel", "arbitrary"),
            vmem_limit_bytes=vmem_limit),
    )(qkv_g, k_in, v_in, w_out_b, b_out)

    return out  # already (b, out_dim, L): no final transpose needed


# ----------------------------------- main ------------------------------------

if __name__ == "__main__":
    B, DIM, L = 2, 16, 16
    HEADS, OUT_DIM = 2, 16            # dim_head = out_dim (per module __init__)
    INNER = HEADS * OUT_DIM

    key = jax.random.PRNGKey(0)
    kx, kw1, kw2, kb2 = jax.random.split(key, 4)

    x = jax.random.normal(kx, (B, DIM, L), dtype=jnp.float32)
    params = {
        "gamma": jnp.ones((1, DIM, 1), jnp.float32),                               # ChanLayerNorm
        "beta": jnp.zeros((1, DIM, 1), jnp.float32),
        "w_qkv": 0.1 * jax.random.normal(kw1, (3 * INNER, DIM), jnp.float32),      # to_qkv (no bias)
        "w_out": 0.1 * jax.random.normal(kw2, (OUT_DIM, INNER), jnp.float32),      # to_out weight
        "b_out": 0.1 * jax.random.normal(kb2, (OUT_DIM,), jnp.float32),            # to_out bias
    }

    fwd = jax.jit(functools.partial(dpsa1d_forward, heads=HEADS,
                                    dim_head=OUT_DIM, length_top_k=-1))
    out = jax.block_until_ready(fwd(x, params))
    assert out.shape == (B, OUT_DIM, L), out.shape
    assert bool(jnp.isfinite(out).all())
    print("KERNEL_OK")
</pallas_src>

<mosaic_0001>
module attributes {stable_mosaic.version = 11 : i64} {
  func.func @_ln_qkv_l2norm_kernel(%arg0: i32, %arg1: i32, %arg2: memref<1x16x16xf32, #tpu.memory_space<vmem>>, %arg3: memref<1x16x1xf32, #tpu.memory_space<vmem>>, %arg4: memref<1x16x1xf32, #tpu.memory_space<vmem>>, %arg5: memref<96x16xbf16, #tpu.memory_space<vmem>>, %arg6: memref<1x96x16xbf16, #tpu.memory_space<vmem>>) attributes {dimension_semantics = [#tpu.dimension_semantics<parallel>, #tpu.dimension_semantics<parallel>], iteration_bounds = array<i64: 2, 1>, scalar_prefetch = 0 : i64, scratch_operands = 0 : i64, tpu.core_type = #tpu.core_type<tc>, window_params = [{transform_indices = @transform_0, window_bounds = array<i64: 1, 16, 16>}, {pipeline_mode = #tpu.pipeline_mode<synchronous>, transform_indices = @transform_1, window_bounds = array<i64: 1, 16, 1>}, {pipeline_mode = #tpu.pipeline_mode<synchronous>, transform_indices = @transform_2, window_bounds = array<i64: 1, 16, 1>}, {pipeline_mode = #tpu.pipeline_mode<synchronous>, transform_indices = @transform_3, window_bounds = array<i64: 96, 16>}, {transform_indices = @transform_4, window_bounds = array<i64: 1, 96, 16>}]} {
    %c0 = arith.constant 0 : index
    %c0_0 = arith.constant 0 : index
    %c0_1 = arith.constant 0 : index
    %0 = vector.load %arg2[%c0, %c0_0, %c0_1] : memref<1x16x16xf32, #tpu.memory_space<vmem>>, vector<1x16x16xf32>
    %1 = vector.shape_cast %0 : vector<1x16x16xf32> to vector<16x16xf32>
    %cst = arith.constant dense<0.000000e+00> : vector<16xf32>
    %2 = vector.multi_reduction <add>, %1, %cst [0] : vector<16x16xf32> to vector<16xf32>
    %3 = vector.shape_cast %2 : vector<16xf32> to vector<1x16xf32>
    %cst_2 = arith.constant 1.600000e+01 : f32
    %4 = vector.broadcast %cst_2 : f32 to vector<1x16xf32>
    %5 = arith.divf %3, %4 : vector<1x16xf32>
    %6 = vector.broadcast %5 : vector<1x16xf32> to vector<16x16xf32>
    %7 = arith.subf %1, %6 : vector<16x16xf32>
    %8 = arith.mulf %7, %7 : vector<16x16xf32>
    %cst_3 = arith.constant dense<0.000000e+00> : vector<16xf32>
    %9 = vector.multi_reduction <add>, %8, %cst_3 [0] : vector<16x16xf32> to vector<16xf32>
    %10 = vector.shape_cast %9 : vector<16xf32> to vector<1x16xf32>
    %cst_4 = arith.constant 1.600000e+01 : f32
    %11 = vector.broadcast %cst_4 : f32 to vector<1x16xf32>
    %12 = arith.divf %10, %11 : vector<1x16xf32>
    %13 = math.sqrt %12 : vector<1x16xf32>
    %cst_5 = arith.constant 9.99999997E-7 : f32
    %14 = vector.broadcast %cst_5 : f32 to vector<1x16xf32>
    %15 = arith.addf %13, %14 : vector<1x16xf32>
    %16 = tpu.reciprocal %15 {approx = true} : vector<1x16xf32> -> vector<1x16xf32>
    %c0_6 = arith.constant 0 : index
    %c0_7 = arith.constant 0 : index
    %c0_8 = arith.constant 0 : index
    %17 = vector.load %arg3[%c0_6, %c0_7, %c0_8] : memref<1x16x1xf32, #tpu.memory_space<vmem>>, vector<1x16x1xf32>
    %18 = vector.shape_cast %17 : vector<1x16x1xf32> to vector<16x1xf32>
    %19 = vector.broadcast %5 : vector<1x16xf32> to vector<16x16xf32>
    %20 = arith.subf %1, %19 : vector<16x16xf32>
    %21 = vector.broadcast %18 : vector<16x1xf32> to vector<16x16xf32>
    %22 = arith.mulf %21, %20 : vector<16x16xf32>
    %23 = vector.broadcast %16 : vector<1x16xf32> to vector<16x16xf32>
    %24 = arith.mulf %22, %23 : vector<16x16xf32>
    %c0_9 = arith.constant 0 : index
    %c0_10 = arith.constant 0 : index
    %c0_11 = arith.constant 0 : index
    %25 = vector.load %arg4[%c0_9, %c0_10, %c0_11] : memref<1x16x1xf32, #tpu.memory_space<vmem>>, vector<1x16x1xf32>
    %26 = vector.shape_cast %25 : vector<1x16x1xf32> to vector<16x1xf32>
    %27 = vector.broadcast %26 : vector<16x1xf32> to vector<16x16xf32>
    %28 = arith.addf %24, %27 : vector<16x16xf32>
    %c0_12 = arith.constant 0 : index
    %c0_13 = arith.constant 0 : index
    %29 = vector.load %arg5[%c0_12, %c0_13] : memref<96x16xbf16, #tpu.memory_space<vmem>>, vector<96x16xbf16>
    %30 = arith.truncf %28 : vector<16x16xf32> to vector<16x16xbf16>
    %cst_14 = arith.constant dense<0.000000e+00> : vector<96x16xf32>
    %31 = tpu.matmul %29, %30, %cst_14 {dimension_numbers = #tpu.dot_dimension_numbers<[1], [0], [0], [1], [0, 0, 1, 1], [], []>} : vector<96x16xbf16>, vector<16x16xbf16>, vector<96x16xf32> -> vector<96x16xf32>
    %32 = vector.extract_strided_slice %31 {offsets = [0, 0], sizes = [64, 16], strides = [1, 1]} : vector<96x16xf32> to vector<64x16xf32>
    %33 = vector.shape_cast %32 : vector<64x16xf32> to vector<4x16x16xf32>
    %34 = arith.mulf %33, %33 : vector<4x16x16xf32>
    %cst_15 = arith.constant dense<0.000000e+00> : vector<4x16xf32>
    %35 = vector.multi_reduction <add>, %34, %cst_15 [1] : vector<4x16x16xf32> to vector<4x16xf32>
    %36 = vector.shape_cast %35 : vector<4x16xf32> to vector<4x1x16xf32>
    %37 = math.sqrt %36 : vector<4x1x16xf32>
    %cst_16 = arith.constant 9.99999997E-7 : f32
    %38 = vector.broadcast %cst_16 : f32 to vector<4x1x16xf32>
    %39 = arith.addf %37, %38 : vector<4x1x16xf32>
    %40 = tpu.reciprocal %39 {approx = true} : vector<4x1x16xf32> -> vector<4x1x16xf32>
    %41 = vector.broadcast %40 : vector<4x1x16xf32> to vector<4x16x16xf32>
    %42 = arith.mulf %33, %41 : vector<4x16x16xf32>
    %43 = vector.shape_cast %42 : vector<4x16x16xf32> to vector<64x16xf32>
    %44 = arith.truncf %43 : vector<64x16xf32> to vector<64x16xbf16>
    %c0_17 = arith.constant 0 : index
    %c0_18 = arith.constant 0 : index
    %c0_19 = arith.constant 0 : index
    %45 = vector.load %arg6[%c0_17, %c0_18, %c0_19] : memref<1x96x16xbf16, #tpu.memory_space<vmem>>, vector<1x64x16xbf16>
    %46 = vector.shape_cast %45 : vector<1x64x16xbf16> to vector<64x16xbf16>
    %47 = vector.shape_cast %44 : vector<64x16xbf16> to vector<1x64x16xbf16>
    tpu.vector_store %arg6[%c0_17, %c0_18, %c0_19], %47 {strides = array<i32>} : memref<1x96x16xbf16, #tpu.memory_space<vmem>>, vector<1x64x16xbf16>,
    %48 = vector.extract_strided_slice %31 {offsets = [64, 0], sizes = [32, 16], strides = [1, 1]} : vector<96x16xf32> to vector<32x16xf32>
    %49 = arith.truncf %48 : vector<32x16xf32> to vector<32x16xbf16>
    %c0_20 = arith.constant 0 : index
    %c64 = arith.constant 64 : index
    %c0_21 = arith.constant 0 : index
    %50 = vector.load %arg6[%c0_20, %c64, %c0_21] : memref<1x96x16xbf16, #tpu.memory_space<vmem>>, vector<1x32x16xbf16>
    %51 = vector.shape_cast %50 : vector<1x32x16xbf16> to vector<32x16xbf16>
    %52 = vector.shape_cast %49 : vector<32x16xbf16> to vector<1x32x16xbf16>
    tpu.vector_store %arg6[%c0_20, %c64, %c0_21], %52 {strides = array<i32>} : memref<1x96x16xbf16, #tpu.memory_space<vmem>>, vector<1x32x16xbf16>,
    return
  }
  func.func @transform_0(%arg0: i32, %arg1: i32) -> (i32, i32, i32) {
    %c0_i32 = arith.constant 0 : i32
    %c0_i32_0 = arith.constant 0 : i32
    return %arg0, %c0_i32, %arg1 : i32, i32, i32
  }
  func.func @transform_1(%arg0: i32, %arg1: i32) -> (i32, i32, i32) {
    %c0_i32 = arith.constant 0 : i32
    %c0_i32_0 = arith.constant 0 : i32
    %c0_i32_1 = arith.constant 0 : i32
    %c0_i32_2 = arith.constant 0 : i32
    return %c0_i32, %c0_i32_0, %c0_i32_1 : i32, i32, i32
  }
  func.func @transform_2(%arg0: i32, %arg1: i32) -> (i32, i32, i32) {
    %c0_i32 = arith.constant 0 : i32
    %c0_i32_0 = arith.constant 0 : i32
    %c0_i32_1 = arith.constant 0 : i32
    %c0_i32_2 = arith.constant 0 : i32
    return %c0_i32, %c0_i32_0, %c0_i32_1 : i32, i32, i32
  }
  func.func @transform_3(%arg0: i32, %arg1: i32) -> (i32, i32) {
    %c0_i32 = arith.constant 0 : i32
    %c0_i32_0 = arith.constant 0 : i32
    %c0_i32_1 = arith.constant 0 : i32
    return %c0_i32, %c0_i32_0 : i32, i32
  }
  func.func @transform_4(%arg0: i32, %arg1: i32) -> (i32, i32, i32) {
    %c0_i32 = arith.constant 0 : i32
    %c0_i32_0 = arith.constant 0 : i32
    return %arg0, %c0_i32, %arg1 : i32, i32, i32
  }
}

module attributes {stable_mosaic.version = 11 : i64} {
  func.func @_attn_proj_kernel(%arg0: i32, %arg1: i32, %arg2: i32, %arg3: memref<1x2x16x16xbf16, #tpu.memory_space<vmem>>, %arg4: memref<1x2x16x4xbf16, #tpu.memory_space<vmem>>, %arg5: memref<1x2x16x4xbf16, #tpu.memory_space<vmem>>, %arg6: memref<16x32xbf16, #tpu.memory_space<vmem>>, %arg7: memref<16x1xf32, #tpu.memory_space<vmem>>, %arg8: memref<1x16x16xf32, #tpu.memory_space<vmem>>, %arg9: memref<32x16xbf16, #tpu.memory_space<vmem>>) attributes {dimension_semantics = [#tpu.dimension_semantics<parallel>, #tpu.dimension_semantics<parallel>, #tpu.dimension_semantics<arbitrary>], iteration_bounds = array<i64: 2, 1, 2>, scalar_prefetch = 0 : i64, scratch_operands = 1 : i64, tpu.core_type = #tpu.core_type<tc>, window_params = [{transform_indices = @transform_0, window_bounds = array<i64: 1, 2, 16, 16>}, {transform_indices = @transform_1, window_bounds = array<i64: 1, 2, 16, 4>}, {transform_indices = @transform_2, window_bounds = array<i64: 1, 2, 16, 4>}, {pipeline_mode = #tpu.pipeline_mode<synchronous>, transform_indices = @transform_3, window_bounds = array<i64: 16, 32>}, {pipeline_mode = #tpu.pipeline_mode<synchronous>, transform_indices = @transform_4, window_bounds = array<i64: 16, 1>}, {transform_indices = @transform_5, window_bounds = array<i64: 1, 16, 16>}]} {
    %c0 = arith.constant 0 : index
    %0 = arith.index_cast %arg2 : i32 to index
    %c0_0 = arith.constant 0 : index
    %c0_1 = arith.constant 0 : index
    %1 = vector.load %arg3[%c0, %0, %c0_0, %c0_1] : memref<1x2x16x16xbf16, #tpu.memory_space<vmem>>, vector<1x1x16x16xbf16>
    %2 = vector.shape_cast %1 : vector<1x1x16x16xbf16> to vector<16x16xbf16>
    %c0_2 = arith.constant 0 : index
    %3 = arith.index_cast %arg2 : i32 to index
    %c0_3 = arith.constant 0 : index
    %c0_4 = arith.constant 0 : index
    %4 = vector.load %arg4[%c0_2, %3, %c0_3, %c0_4] : memref<1x2x16x4xbf16, #tpu.memory_space<vmem>>, vector<1x1x16x4xbf16>
    %5 = vector.shape_cast %4 : vector<1x1x16x4xbf16> to vector<16x4xbf16>
    %c0_5 = arith.constant 0 : index
    %6 = arith.index_cast %arg2 : i32 to index
    %c0_6 = arith.constant 0 : index
    %c0_7 = arith.constant 0 : index
    %7 = vector.load %arg5[%c0_5, %6, %c0_6, %c0_7] : memref<1x2x16x4xbf16, #tpu.memory_space<vmem>>, vector<1x1x16x4xbf16>
    %8 = vector.shape_cast %7 : vector<1x1x16x4xbf16> to vector<16x4xbf16>
    %cst = arith.constant dense<0.000000e+00> : vector<16x4xf32>
    %9 = tpu.matmul %2, %5, %cst {dimension_numbers = #tpu.dot_dimension_numbers<[0], [0], [1], [1], [0, 1, 1, 1], [], []>} : vector<16x16xbf16>, vector<16x4xbf16>, vector<16x4xf32> -> vector<16x4xf32>
    %10 = math.exp %9 : vector<16x4xf32>
    %cst_8 = arith.constant dense<0.000000e+00> : vector<16xf32>
    %11 = vector.multi_reduction <add>, %10, %cst_8 [1] : vector<16x4xf32> to vector<16xf32>
    %12 = vector.shape_cast %11 : vector<16xf32> to vector<16x1xf32>
    %13 = tpu.reciprocal %12 {approx = true} : vector<16x1xf32> -> vector<16x1xf32>
    %14 = vector.broadcast %13 : vector<16x1xf32> to vector<16x4xf32>
    %15 = arith.mulf %10, %14 : vector<16x4xf32>
    %16 = arith.truncf %15 : vector<16x4xf32> to vector<16x4xbf16>
    %cst_9 = arith.constant dense<0.000000e+00> : vector<16x16xf32>
    %17 = tpu.matmul %8, %16, %cst_9 {dimension_numbers = #tpu.dot_dimension_numbers<[1], [1], [0], [0], [0, 0, 1, 0], [], []>} : vector<16x4xbf16>, vector<16x4xbf16>, vector<16x16xf32> -> vector<16x16xf32>
    %c16_i32 = arith.constant 16 : i32
    %18 = arith.muli %arg2, %c16_i32 : i32
    %19 = tpu.assume_multiple %18, 16 : i32
    %20 = arith.truncf %17 : vector<16x16xf32> to vector<16x16xbf16>
    %21 = arith.index_cast %19 : i32 to index
    %c0_10 = arith.constant 0 : index
    %22 = vector.load %arg9[%21, %c0_10] : memref<32x16xbf16, #tpu.memory_space<vmem>>, vector<16x16xbf16>
    tpu.vector_store %arg9[%21, %c0_10], %20 {strides = array<i32>} : memref<32x16xbf16, #tpu.memory_space<vmem>>, vector<16x16xbf16>,
    %c1_i32 = arith.constant 1 : i32
    %23 = arith.cmpi eq, %arg2, %c1_i32 : i32
    %24 = arith.extui %23 : i1 to i32
    %c0_i32 = arith.constant 0 : i32
    %25 = arith.cmpi ne, %24, %c0_i32 : i32
    scf.if %25 {
      %c0_11 = arith.constant 0 : index
      %c0_12 = arith.constant 0 : index
      %26 = vector.load %arg6[%c0_11, %c0_12] : memref<16x32xbf16, #tpu.memory_space<vmem>>, vector<16x32xbf16>
      %c0_13 = arith.constant 0 : index
      %c0_14 = arith.constant 0 : index
      %27 = vector.load %arg9[%c0_13, %c0_14] : memref<32x16xbf16, #tpu.memory_space<vmem>>, vector<32x16xbf16>
      %cst_15 = arith.constant dense<0.000000e+00> : vector<16x16xf32>
      %28 = tpu.matmul %26, %27, %cst_15 {dimension_numbers = #tpu.dot_dimension_numbers<[1], [0], [0], [1], [0, 0, 1, 1], [], []>} : vector<16x32xbf16>, vector<32x16xbf16>, vector<16x16xf32> -> vector<16x16xf32>
      %c0_16 = arith.constant 0 : index
      %c0_17 = arith.constant 0 : index
      %29 = vector.load %arg7[%c0_16, %c0_17] : memref<16x1xf32, #tpu.memory_space<vmem>>, vector<16x1xf32>
      %30 = vector.broadcast %29 : vector<16x1xf32> to vector<16x16xf32>
      %31 = arith.addf %28, %30 : vector<16x16xf32>
      %c0_18 = arith.constant 0 : index
      %c0_19 = arith.constant 0 : index
      %c0_20 = arith.constant 0 : index
      %32 = vector.load %arg8[%c0_18, %c0_19, %c0_20] : memref<1x16x16xf32, #tpu.memory_space<vmem>>, vector<1x16x16xf32>
      %33 = vector.shape_cast %32 : vector<1x16x16xf32> to vector<16x16xf32>
      %34 = vector.shape_cast %31 : vector<16x16xf32> to vector<1x16x16xf32>
      tpu.vector_store %arg8[%c0_18, %c0_19, %c0_20], %34 {strides = array<i32>} : memref<1x16x16xf32, #tpu.memory_space<vmem>>, vector<1x16x16xf32>,
    } else {
    }
    return
  }
  func.func @transform_0(%arg0: i32, %arg1: i32, %arg2: i32) -> (i32, i32, i32, i32) {
    %c0_i32 = arith.constant 0 : i32
    %c0_i32_0 = arith.constant 0 : i32
    %c0_i32_1 = arith.constant 0 : i32
    return %arg0, %c0_i32, %c0_i32_0, %arg1 : i32, i32, i32, i32
  }
  func.func @transform_1(%arg0: i32, %arg1: i32, %arg2: i32) -> (i32, i32, i32, i32) {
    %c0_i32 = arith.constant 0 : i32
    %c0_i32_0 = arith.constant 0 : i32
    %c0_i32_1 = arith.constant 0 : i32
    %c0_i32_2 = arith.constant 0 : i32
    return %arg0, %c0_i32, %c0_i32_0, %c0_i32_1 : i32, i32, i32, i32
  }
  func.func @transform_2(%arg0: i32, %arg1: i32, %arg2: i32) -> (i32, i32, i32, i32) {
    %c0_i32 = arith.constant 0 : i32
    %c0_i32_0 = arith.constant 0 : i32
    %c0_i32_1 = arith.constant 0 : i32
    %c0_i32_2 = arith.constant 0 : i32
    return %arg0, %c0_i32, %c0_i32_0, %c0_i32_1 : i32, i32, i32, i32
  }
  func.func @transform_3(%arg0: i32, %arg1: i32, %arg2: i32) -> (i32, i32) {
    %c0_i32 = arith.constant 0 : i32
    %c0_i32_0 = arith.constant 0 : i32
    %c0_i32_1 = arith.constant 0 : i32
    return %c0_i32, %c0_i32_0 : i32, i32
  }
  func.func @transform_4(%arg0: i32, %arg1: i32, %arg2: i32) -> (i32, i32) {
    %c0_i32 = arith.constant 0 : i32
    %c0_i32_0 = arith.constant 0 : i32
    %c0_i32_1 = arith.constant 0 : i32
    return %c0_i32, %c0_i32_0 : i32, i32
  }
  func.func @transform_5(%arg0: i32, %arg1: i32, %arg2: i32) -> (i32, i32, i32) {
    %c0_i32 = arith.constant 0 : i32
    %c0_i32_0 = arith.constant 0 : i32
    return %arg0, %c0_i32, %arg1 : i32, i32, i32
  }
}

</mosaic_0001>

<bundles_post_ra>
// kernel: dpsa1d_forward.2
= control target key start
LH: loop header
LB: loop body
LE: loop exit
PB: predicated region body
PF: predicated region fallthrough
CT: control target
= control target key end

     0   :  { %9 = vsyncpa [#allocation3], 0  ;;  %s1591_s0 = inlined_call_operand.hbm [shape: f32[2,16,16], index: 0, kind: input, shape index: {}]   ;;  %s1592_s1 = inlined_call_operand.hbm [shape: f32[1,16,1], index: 1, kind: input, shape index: {}]   ;;  %s1593_s2 = inlined_call_operand.hbm [shape: f32[1,16,1], index: 2, kind: input, shape index: {}]   ;;  %s1594_s3 = inlined_call_operand.hbm [shape: bf16[96,16], index: 3, kind: input, shape index: {}]   ;;  %s1595_s4 = inlined_call_operand.hbm [shape: bf16[2,96,16], index: 4, kind: output, shape index: {}]  }
   0x1   :  { %11 = vsyncpa [#allocation3 + $0x1], 0 }
   0x2   :  { %12 = vsyncpa [#allocation6], 0 }
   0x3   :  { %13 = vsyncpa [#allocation9], 0 }
   0x4   :  { %14 = vsyncpa [#allocation4], 0 }
   0x5   :  { %16 = vsyncpa [#allocation4 + $0x1], 0  ;;  %s1216_s15 = smov 0   ;;  %s1218_s16 = smov 0  }
   0x6   :  { %s1220_s17 = smov 0   ;;  %s1222_s18 = smov 0  }
   0x7   :  { %s1224_s19 = smov 0   ;;  %s1226_s20 = smov 0  }
   0x8 LB: > { %s765_s21 = sadd.s32 4294967295, %s1177_s20   ;;  %s766_s22 = sadd.s32 4294967294, %s1177_s20   ;;  %s1177_s20 = sphi %s1226_s20, %s22_s20   ;;  %s1173_s19 = sphi %s1224_s19, %s1622_s19   ;;  %s1169_s18 = sphi %s1222_s18, %s1621_s18   ;;  %s1165_s17 = sphi %s1220_s17, %s1620_s17   ;;  %s1161_s16 = sphi %s1218_s16, %s1619_s16   ;;  %s1157_s15 = sphi %s1216_s15, %s1618_s15  }
   0x9   : > { %p56_p0 = scmp.ne.s32.totalorder %s1161_s16, %s1157_s15  ;;  %p1250_p1 = scmp.eq.s32.totalorder %s765_s21, 0 }
   0xa   : > { %p1254_p2 = scmp.eq.s32.totalorder %s765_s21, 1  ;;  %p151_p3 = scmp.eq.s32.totalorder %s766_s22, 1 }
   0xb   : > { %s1601_s23 = scalar_select %p1250_p1, 1, 0 }
   0xc   : > { %s1602_s24 = scalar_select %p1254_p2, 1, 0 }
   0xd   : > { %p1260_p4 = por %p1250_p1, %p56_p0  ;;  %p767_p5 = scmp.ge.s32.totalorder %s1177_s20, 1 }
   0xe   : > { %p1265_p6 = por %p151_p3, %p56_p0  ;;  %p158_p7 = scmp.lt.s32.totalorder %s1177_s20, 3 }
   0xf   : > { %s1603_s25 = scalar_select %p1260_p4, 1, 0 }
  0x10   : > { %s1604_s26 = scalar_select %p1265_p6, 1, 0 }
  0x11   : > { %p1270_p8 = pnand %p767_p5, %p158_p7  ;;  %s1179_s28 = smov [#allocation5]  }
  0x12   : > { %1605 = sst [smem:[#allocation15_spill]] %s1604_s26  ;;  %s170_s29 = sshll.u32 %s1179_s28, 4  ;;  %s1274_s29 = int_to_ptr.vmem [resolvable:$true] %s170_s29 }
  0x13   : > { %s1606_s27 = scalar_select %p1270_p8, 1, 0 }
  0x14   : > { %p861_p9 = pneg %p1270_p8  ;;  %s1180_s5 = smov [#allocation7]  }
  0x15   : > { %s183_s6 = sshll.u32 %s1180_s5, 4  ;;  %s1181_s7 = smov [#allocation8]   ;;  %s1285_s6 = int_to_ptr.vmem [resolvable:$true] %s183_s6 }
  0x16   : > { %p1281_p11 = pnand %p861_p9, %p1250_p1  ;;  %s1287_s8 = sshll.u32 %s1181_s7, 4  ;;  %s197_s8 = int_to_ptr.vmem [resolvable:$true] %s1287_s8 }
  0x17   : > { %s973_s11 = scalar_lea.hbm %s1592_s1, 256 }
  0x18   : > { %p974_p12 = scmp.ne.s32.totalorder %s1592_s1, %s973_s11  ;;  %p1297_p13 = pneg %p1281_p11 }
  0x19   : > { %p980_p5 = scmp.lt.u32.totalorder %s973_s11, %s1592_s1 }
  0x1a   : > { %p976_p0 = pnand %p1297_p13, %p974_p12 }
  0x1c   : > { %p977_p3 = pneg %p976_p0 }
  0x1e   : > { %p982_p7 = pnand %p980_p5, %p977_p3 }
  0x20   : > { %985 = shalt.err (!%p982_p7)
}
  0x21   : > { %s986_s28 = scalar_lea.vmem %s1274_s29, 256  ;;  %p994_p1 = scmp.lt.s32.totalorder %s1274_s29, %s1274_s29 }
  0x22   : > { %p987_p9 = scmp.ne.s32.totalorder %s1274_s29, %s986_s28  ;;  %p995_p4 = scmp.lt.s32.totalorder %s986_s28, %s986_s28 }
  0x24   : > { %p989_p10 = pnand %p987_p9, %p1297_p13  ;;  %p996_p12 = por %p995_p4, %p994_p1 }
  0x26   : > { %p990_p6 = pneg %p989_p10 }
  0x28   : > { %p997_p0 = pnand %p996_p12, %p990_p6 }
  0x2a   : > { %1000 = shalt.err (!%p997_p0)
}
  0x2b   : > { %s1182_s5 = smov 128   ;;  %s1183_s7 = smov 8  }
  0x2c   : > { %864 = dma.hbm_to_vmem [thread:$0]  (!%p1281_p11), %s1592_s1, 256, %s1274_s29, [#allocation6], %s1182_s5, %s1182_s5, %s1183_s7  }
  0x2d   : > { %s1001_s13 = scalar_lea.hbm %s1593_s2, 256 }
  0x2e   : > { %p1002_p1 = scmp.ne.s32.totalorder %s1593_s2, %s1001_s13  ;;  %p1008_p10 = scmp.lt.u32.totalorder %s1001_s13, %s1593_s2 }
  0x30   : > { %p1004_p4 = pnand %p1002_p1, %p1297_p13 }
  0x32   : > { %p1005_p6 = pneg %p1004_p4 }
  0x34   : > { %p1010_p3 = pnand %p1008_p10, %p1005_p6 }
  0x36   : > { %1013 = shalt.err (!%p1010_p3)
}
  0x37   : > { %s1014_s29 = scalar_lea.vmem %s1285_s6, 256  ;;  %p1022_p12 = scmp.lt.s32.totalorder %s1285_s6, %s1285_s6 }
  0x38   : > { %p1015_p5 = scmp.ne.s32.totalorder %s1285_s6, %s1014_s29  ;;  %p1023_p0 = scmp.lt.s32.totalorder %s1014_s29, %s1014_s29 }
  0x3a   : > { %p1017_p7 = pnand %p1015_p5, %p1297_p13  ;;  %p1024_p1 = por %p1023_p0, %p1022_p12 }
  0x3c   : > { %p1018_p9 = pneg %p1017_p7 }
  0x3e   : > { %p1025_p4 = pnand %p1024_p1, %p1018_p9 }
  0x40   : > { %1028 = shalt.err (!%p1025_p4)
}
  0x41   : > { %867 = dma.hbm_to_vmem [thread:$0]  (!%p1281_p11), %s1593_s2, 256, %s1285_s6, [#allocation6], %s1182_s5, %s1182_s5, %s1183_s7  }
  0x42   : > { %s1029_s12 = scalar_lea.hbm %s1594_s3, 768 }
  0x43   : > { %p1030_p6 = scmp.ne.s32.totalorder %s1594_s3, %s1029_s12  ;;  %p1036_p5 = scmp.lt.u32.totalorder %s1029_s12, %s1594_s3 }
  0x45   : > { %p1032_p10 = pnand %p1030_p6, %p1297_p13 }
  0x47   : > { %p1033_p3 = pneg %p1032_p10 }
  0x49   : > { %p1038_p7 = pnand %p1036_p5, %p1033_p3 }
  0x4b   : > { %1041 = shalt.err (!%p1038_p7)
}
  0x4c   : > { %s1042_s29 = scalar_lea.vmem %s197_s8, 768  ;;  %p1050_p1 = scmp.lt.s32.totalorder %s197_s8, %s197_s8 }
  0x4d   : > { %p1043_p9 = scmp.ne.s32.totalorder %s197_s8, %s1042_s29  ;;  %p1051_p4 = scmp.lt.s32.totalorder %s1042_s29, %s1042_s29 }
  0x4f   : > { %p1045_p12 = pnand %p1043_p9, %p1297_p13  ;;  %p1052_p8 = por %p1051_p4, %p1050_p1 }
  0x51   : > { %p1046_p0 = pneg %p1045_p12 }
  0x53   : > { %p1053_p2 = pnand %p1052_p8, %p1046_p0 }
  0x55   : > { %1056 = shalt.err (!%p1053_p2)
}
  0x56   : > { %s1184_s6 = smov 64   ;;  %s1185_s14 = smov 4  }
  0x57   : > { %870 = dma.hbm_to_vmem [thread:$0]  (!%p1281_p11), %s1594_s3, 768, %s197_s8, [#allocation9], %s1184_s6, %s1184_s6, %s1185_s14  }
  0x58   : > { %s43_s10 = sadd.s32 1, %s1165_s17  ;;  %s34_s11 = sadd.s32 1, %s1173_s19 }
  0x59   : > { %p50_p2 = scmp.ne.s32.totalorder %s1165_s17, %s1161_s16  ;;  %p36_p8 = scmp.ge.s32.totalorder %s34_s11, 2 }
  0x5a   : > { %p51_p13 = scmp.eq.s32.totalorder %s1177_s20, 0  ;;  %p1609_p6 = scmp.ne.s32.totalorder %s1602_s24, 0 }
  0x5b   : > { %p882_p3 = scmp.lt.s32.totalorder %s1177_s20, 2  ;;  %s1624_s11 = smov (%p36_p8, %s34_s11), 0 }
  0x5c   : > { %p1373_p10 = por %p1609_p6, %p50_p2  ;;  %p52_p5 = por %p51_p13, %p50_p2 }
  0x5d   : > { %s210_s30 = sand.u32 1, %s1165_s17   ;;  %s38_s13 = ssub.s32 %s1173_s19, %s1624_s11 }
  0x5e   : > { %p41_p7 = scmp.eq.s32.totalorder %s38_s13, 0  ;;  %s772_s8 = sshll.u32 %s210_s30, 4 }
  0x5f   : > { %s807_s21 = sshll.u32 %s1173_s19, 8  ;;  %s214_s6 = scalar_lea.vmem [#allocation2], %s772_s8 }
  0x60   : > { %s1385_s22 = scalar_select %p41_p7, %s1165_s17, %s43_s10  }
  0x61   : > { %s1390_s24 = scalar_lea.hbm %s1591_s0, %s807_s21  ;;  %s222_s14 = sshll.u32 %s214_s6, 4  ;;  %s1392_s14 = int_to_ptr.vmem [resolvable:$true] %s222_s14 }
  0x62   : > { %p1396_p11 = pnand %p882_p3, %p52_p5  ;;  %s1400_s9 = scalar_lea.sflag [#allocation3], %s210_s30 }
  0x63   : > { %s1057_s10 = scalar_lea.hbm %s1390_s24, 256  ;;  %s1062_s21 = scalar_lea.hbm %s1591_s0, 512 }
  0x64   : > { %p1058_p9 = scmp.ne.s32.totalorder %s1390_s24, %s1057_s10  ;;  %p1059_p12 = pneg %p1396_p11 }
  0x65   : > { %p1063_p4 = scmp.lt.u32.totalorder %s1390_s24, %s1591_s0  ;;  %p1064_p2 = scmp.lt.u32.totalorder %s1062_s21, %s1057_s10 }
  0x66   : > { %p1060_p0 = pnand %p1059_p12, %p1058_p9  ;;  %p1066_p13 = scmp.lt.u32.totalorder %s1057_s10, %s1390_s24 }
  0x67   : > { %p1065_p8 = por %p1064_p2, %p1063_p4 }
  0x68   : > { %p1061_p1 = pneg %p1060_p0 }
  0x69   : > { %p1067_p6 = por %p1066_p13, %p1065_p8 }
  0x6b   : > { %p1068_p3 = pnand %p1067_p6, %p1061_p1 }
  0x6d   : > { %1071 = shalt.err (!%p1068_p3)
}
  0x6e   : > { %s1072_s30 = scalar_lea.vmem %s1392_s14, 256  ;;  %s1186_s6 = smov [#allocation2]  }
  0x6f   : > { %p1073_p5 = scmp.ne.s32.totalorder %s1392_s14, %s1072_s30  ;;  %s1077_s13 = sshll.u32 %s1186_s6, 4  ;;  %s1078_s13 = int_to_ptr.vmem [resolvable:$false] %s1077_s13 }
  0x70   : > { %s1079_s8 = scalar_lea.vmem %s1078_s13, 512  ;;  %p1080_p0 = scmp.lt.s32.totalorder %s1392_s14, %s1078_s13 }
  0x71   : > { %p1075_p7 = pnand %p1073_p5, %p1059_p12  ;;  %p1081_p4 = scmp.lt.s32.totalorder %s1079_s8, %s1072_s30 }
  0x73   : > { %p1076_p9 = pneg %p1075_p7  ;;  %p1082_p2 = por %p1081_p4, %p1080_p0 }
  0x75   : > { %p1083_p8 = pnand %p1082_p2, %p1076_p9 }
  0x77   : > { %1086 = shalt.err (!%p1083_p8)
}
  0x78   : > { %874 = dma.hbm_to_vmem [thread:$0]  (!%p1396_p11), %s1390_s24, 256, %s1392_s14, %s1400_s9, %s1182_s5, %s1182_s5, %s1183_s7  }
  0x79   : > { %p1612_p12 = scmp.ne.s32.totalorder %s1606_s27, 0 }
  0x7a   : > { %s1434_s10 = sand.u32 (!%p1612_p12), 1, %s1161_s16   ;;  %p1613_p1 = scmp.ne.s32.totalorder (!%p1612_p12), %s1603_s25, 0 }
  0x7b   : > { %234 = sbr.rel (%p1612_p12) target bundleno = 563 (0x233), region = 36  ;;  %s776_s21 = sshll.u32 (!%p1612_p12), %s1434_s10, 4 }
  0x7c   : > { %s237_s28 = scalar_lea.sflag (!%p1612_p12), [#allocation3], %s1434_s10  ;;  %s240_s29 = scalar_lea.vmem (!%p1612_p12), [#allocation2], %s776_s21 }
  0x82   : > { %1140 = dma.done.wait (%p1613_p1), %s237_s28, 256  }
  0x83   : > { %1142 = vsyncadd (%p1613_p1), %s237_s28, 4294967040  ;;  %p1614_p13 = scmp.ne.s32.totalorder %s1601_s23, 0 }
  0x85   : > { %1144 = dma.done.wait (%p1614_p13), [#allocation6], 512  }
  0x86   : > { %1146 = vsyncadd (%p1614_p13), [#allocation6], 4294966784 }
  0x87   : > { %1148 = dma.done.wait (%p1614_p13), [#allocation9], 768  }
  0x88   : > { %1150 = vsyncadd (%p1614_p13), [#allocation9], 4294966528  ;;  %v1187_v0 = vmov 0   ;;  %v331_v1 = vld [vmem:[#allocation7] sm:$0xff]  ;;  %v315_v2 = vld [vmem:[#allocation5] sm:$0xff]  ;;  %vm280_vm0 = vcmask 130048  }
  0x89   : > { %946 = vset.pattern.permute.xlu1 %v1187_v0  ;;  %945 = vset.pattern.permute.xlu0 %v1187_v0  ;;  %v332_v3 = vld [vmem:[#allocation7 + $0x8] sm:$0xff]  ;;  %v316_v4 = vld [vmem:[#allocation5 + $0x8] sm:$0xff]  ;;  %v278_v5 = vld [vmem:[%s240_s29] sm:$0xff]  ;;  %s843_s23 = smul.u32 48, %s1434_s10  ;;  %vm607_vm3 = vcmask 125952   ;;  %s637_s14 = scalar_lea.sflag [#allocation4], %s1434_s10 }
  0x8a   : > { %335 = vperm.xlu1 %946, %v331_v1   ;;  %319 = vperm.xlu0 %945, %v315_v2   ;;  %v279_v6 = vld [vmem:[%s240_s29 + $0x8] sm:$0xff]  ;;  %v947_v7 = vld [vmem:[#allocation8] sm:$0xff]   ;;  %v948_v8 = vld [vmem:[#allocation8 + $0x10] sm:$0xff]   ;;  %v281_v9 = vsel %vm280_vm0, %v278_v5, 0.0  ;;  %s844_s27 = smul.u32 768, %s1169_s18  ;;  %s1188_s9 = smov [#allocation10]  }
  0x8b   : > { %v282_v10 = vsel %vm280_vm0, %v279_v6, 0.0  ;;  %829 = vmatprep.mubr.msk.bf16.mxu0 %vm280_vm0, %v947_v7  ;;  %833 = vmatprep.mubr.msk.bf16.mxu1 %vm280_vm0, %v948_v8  ;;  %v949_v51 = vld [vmem:[#allocation8 + $0x8] sm:$0xff]   ;;  %v950_v52 = vld [vmem:[#allocation8 + $0x18] sm:$0xff]   ;;  %v951_v53 = vld [vmem:[#allocation8 + $0x20] sm:$0xff]   ;;  %s1501_s25 = scalar_lea.vmem [#allocation10], %s843_s23  ;;  %s1091_s30 = sshll.u32 %s1188_s9, 4  ;;  %s1092_s30 = int_to_ptr.vmem [resolvable:$false] %s1091_s30 }
  0x8c   : > { %v283_v11 = vadd.f32 %v282_v10, %v281_v9  ;;  %v952_v54 = vld [vmem:[#allocation8 + $0x28] sm:$0xff]   ;;  %s651_s5 = sshll.u32 %s1501_s25, 4  ;;  %s1528_s24 = scalar_lea.hbm %s1595_s4, %s844_s27  ;;  %s1530_s5 = int_to_ptr.vmem [resolvable:$true] %s651_s5 }
  0x8d   : > { %s1087_s26 = scalar_lea.vmem %s1530_s5, 768  ;;  %s1093_s6 = scalar_lea.vmem %s1092_s30, 1536 }
  0x8e   : > { %340 = vperm.xlu1 %946, %v332_v3   ;;  %324 = vperm.xlu0 %945, %v316_v4   ;;  %v284_v12 = vrot.slane %v283_v11, 4  ;;  %p1088_p11 = scmp.ne.s32.totalorder %s1530_s5, %s1087_s26  ;;  %p1094_p5 = scmp.lt.s32.totalorder %s1530_s5, %s1092_s30 }
  0x8f   : > { %p1095_p7 = scmp.lt.s32.totalorder %s1093_s6, %s1087_s26 }
  0x90   : > { %v285_v13 = vadd.f32 %v284_v12, %v283_v11  ;;  %p1089_p6 = pnand %p1088_p11, %p1373_p10 }
  0x91   : > { %p1096_p9 = por %p1095_p7, %p1094_p5 }
  0x92   : > { %v286_v14 = vrot.slane %v285_v13, 2  ;;  %p1090_p3 = pneg %p1089_p6 }
  0x94   : > { %v287_v15 = vadd.f32 %v286_v14, %v285_v13  ;;  %p1097_p0 = pnand %p1096_p9, %p1090_p3 }
  0x96   : > { %v288_v16 = vrot.slane %v287_v15, 1 }
  0x98   : > { %v289_v17 = vadd.f32 %v288_v16, %v287_v15 }
  0x9a   : > { %v291_v18 = vmul.f32 0.0625, %v289_v17 }
  0x9c   : > { %v292_v19 = vsub.f32 %v278_v5, %v291_v18  ;;  %v293_v20 = vsub.f32 %v279_v6, %v291_v18 }
  0x9e   : > { %v294_v21 = vmul.f32 %v292_v19, %v292_v19  ;;  %v295_v22 = vmul.f32 %v293_v20, %v293_v20 }
  0xa0   : > { %v296_v23 = vsel %vm280_vm0, %v294_v21, 0.0  ;;  %v297_v24 = vsel %vm280_vm0, %v295_v22, 0.0 }
  0xa1   : > { %v298_v25 = vadd.f32 %v297_v24, %v296_v23 }
  0xa3   : > { %v299_v26 = vrot.slane %v298_v25, 4 }
  0xa5   : > { %v300_v27 = vadd.f32 %v299_v26, %v298_v25 }
  0xa7   : > { %v301_v28 = vrot.slane %v300_v27, 2 }
  0xa9   : > { %v302_v29 = vadd.f32 %v301_v28, %v300_v27 }
  0xab   : > { %v303_v30 = vrot.slane %v302_v29, 1 }
  0xad   : > { %v304_v31 = vadd.f32 %v303_v30, %v302_v29 }
  0xaf   : > { %v305_v32 = vmul.f32 0.0625, %v304_v31 }
  0xb1   : > { %953 = vrsqrt.f32 %v305_v32  ;;  %vm308_vm1 = vcmp.eq.f32.partialorder %v305_v32, inf  ;;  %v311_v35 = vand.u32 2147483648, %v305_v32  ;;  %vm310_vm2 = vcmp.eq.f32.partialorder %v305_v32, 0.0 }
  0xbb   : > { %v954_v33 = vpop.eup %953 }
  0xbc   : > { %v307_v34 = vmul.f32 %v954_v33, %v305_v32 }
  0xbe   : > { %v309_v36 = vsel %vm308_vm1, %v305_v32, %v307_v34 }
  0xbf   : > { %v312_v37 = vsel %vm310_vm2, %v311_v35, %v309_v36 }
  0xc0   : > { %v313_v38 = vadd.f32 1e-06, %v312_v37 }
  0xc2   : > { %955 = vrcp.f32 %v313_v38 }
  0xcc   : > { %v956_v41 = vpop.eup %955 }
 0x109   : > { %v320_v39 = vpop.permute.xlu0 %319  ;;  %v336_v42 = vpop.permute.xlu1 %335 }
 0x10a   : > { %v327_v40 = vmul.f32 %v320_v39, %v292_v19 }
 0x10c   : > { %v329_v44 = vmul.f32 %v956_v41, %v327_v40 }
 0x10d   : > { %v325_v43 = vpop.permute.xlu0 %324  ;;  %v341_v47 = vpop.permute.xlu1 %340 }
 0x10e   : > { %v328_v45 = vmul.f32 %v325_v43, %v293_v20  ;;  %v343_v48 = vadd.f32 %v336_v42, %v329_v44 }
 0x110   : > { %v330_v46 = vmul.f32 %v956_v41, %v328_v45 }
 0x112   : > { %v344_v49 = vadd.f32 %v341_v47, %v330_v46 }
 0x114   : > { %v357_v50 = vpack.c.bf16 %v344_v49, %v343_v48 }
 0x116   : > { %827 = vmatprep.subr.bf16.mxu0 %v357_v50  ;;  %841 = vmatprep.subr.bf16.mxu1 %v357_v50 }
 0x117   : > { %828 = vmatpush3.bf16.msra.mxu0 %v357_v50  ;;  %842 = vmatpush3.bf16.msra.mxu1 %v357_v50 }
 0x11a   : > { %830 = vmatmul.mubr.msk.bf16.vlgmr.msra.gmra.mrb[0].mxu0 %vm280_vm0, %v949_v51  ;;  %834 = vmatmul.mubr.msk.bf16.vlgmr.msra.gmra.mrb[0].mxu1 %vm280_vm0, %v950_v52 }
 0x11b   : > { %837 = vmatprep.mubr.msk.bf16.mxu1 %vm280_vm0, %v951_v53 }
 0x122   : > { %838 = vmatmul.mubr.msk.bf16.gmra.mrb[4].mxu1 %vm280_vm0, %v952_v54 }
 0x1ed   : > { %v1460_v55 = vpop.f32.mrb[0].mxu0  ;;  %v1462_v56 = vpop.f32.mrb[0].mxu1 }
 0x1ee   : > { %v489_v57 = vmul.f32 %v1460_v55, %v1460_v55  ;;  %v493_v58 = vmul.f32 %v1462_v56, %v1462_v56  ;;  %v1468_v59 = vpop.f32.mrb[1].mxu0  ;;  %v1470_v60 = vpop.f32.mrb[1].mxu1 }
 0x1ef   : > { %v487_v61 = vmul.f32 %v1468_v59, %v1468_v59  ;;  %v491_v62 = vmul.f32 %v1470_v60, %v1470_v60  ;;  %v1476_v63 = vpop.f32.mrb[2].mxu0  ;;  %v1478_v0 = vpop.f32.mrb[2].mxu1 }
 0x1f0   : > { %v490_v1 = vmul.f32 %v1476_v63, %v1476_v63  ;;  %v494_v2 = vmul.f32 %v1478_v0, %v1478_v0  ;;  %v1484_v3 = vpop.f32.mrb[3].mxu0  ;;  %v1486_v4 = vpop.f32.mrb[3].mxu1  ;;  %v504_v5 = vsel %vm280_vm0, %v489_v57, 0.0  ;;  %v522_v6 = vsel %vm280_vm0, %v493_v58, 0.0 }
 0x1f1   : > { %v488_v7 = vmul.f32 %v1484_v3, %v1484_v3  ;;  %v492_v8 = vmul.f32 %v1486_v4, %v1486_v4  ;;  %v495_v9 = vsel %vm280_vm0, %v487_v61, 0.0  ;;  %v513_v10 = vsel %vm280_vm0, %v491_v62, 0.0 }
 0x1f2   : > { %v505_v11 = vsel %vm280_vm0, %v490_v1, 0.0  ;;  %v523_v12 = vsel %vm280_vm0, %v494_v2, 0.0 }
 0x1f3   : > { %v506_v13 = vadd.f32 %v505_v11, %v504_v5  ;;  %v524_v14 = vadd.f32 %v523_v12, %v522_v6  ;;  %v496_v15 = vsel %vm280_vm0, %v488_v7, 0.0  ;;  %v514_v16 = vsel %vm280_vm0, %v492_v8, 0.0 }
 0x1f4   : > { %v497_v17 = vadd.f32 %v496_v15, %v495_v9  ;;  %v515_v18 = vadd.f32 %v514_v16, %v513_v10 }
 0x1f5   : > { %v507_v19 = vrot.slane %v506_v13, 4  ;;  %v525_v20 = vrot.slane %v524_v14, 4  ;;  %v839_v21 = vpop.f32.mrb[4].mxu1 }
 0x1f6   : > { %v498_v22 = vrot.slane %v497_v17, 4  ;;  %v516_v23 = vrot.slane %v515_v18, 4  ;;  %v818_v24 = vpack.c.bf16 %v839_v21, %v839_v21  ;;  %v472_v25 = vpop.f32.mrb[5].mxu1 }
 0x1f7   : > { %v508_v26 = vadd.f32 %v507_v19, %v506_v13  ;;  %v526_v27 = vadd.f32 %v525_v20, %v524_v14  ;;  %v816_v28 = vpack.c.bf16 %v472_v25, %v472_v25  ;;  %v840_v29 = vpop.f32.mrb[6].mxu1 }
 0x1f8   : > { %v499_v30 = vadd.f32 %v498_v22, %v497_v17  ;;  %v517_v31 = vadd.f32 %v516_v23, %v515_v18  ;;  %634 = vst.msk [vmem:[%s1501_s25 + $0x28] sm:$0xf] %vm607_vm3, %v818_v24  ;;  %v819_v32 = vpack.c.bf16 %v840_v29, %v840_v29  ;;  %v475_v33 = vpop.f32.mrb[7].mxu1 }
 0x1f9   : > { %v509_v34 = vrot.slane %v508_v26, 2  ;;  %v527_v35 = vrot.slane %v526_v27, 2  ;;  %632 = vst.msk [vmem:[%s1501_s25 + $0x20] sm:$0xf] %vm607_vm3, %v816_v28  ;;  %v817_v36 = vpack.c.bf16 %v475_v33, %v475_v33 }
 0x1fa   : > { %v500_v37 = vrot.slane %v499_v30, 2  ;;  %v518_v38 = vrot.slane %v517_v31, 2  ;;  %635 = vst.msk [vmem:[%s1501_s25 + $0x2c] sm:$0xf] %vm607_vm3, %v819_v32 }
 0x1fb   : > { %v510_v39 = vadd.f32 %v509_v34, %v508_v26  ;;  %v528_v40 = vadd.f32 %v527_v35, %v526_v27  ;;  %633 = vst.msk [vmem:[%s1501_s25 + $0x24] sm:$0xf] %vm607_vm3, %v817_v36 }
 0x1fc   : > { %v501_v41 = vadd.f32 %v500_v37, %v499_v30  ;;  %v519_v42 = vadd.f32 %v518_v38, %v517_v31 }
 0x1fd   : > { %v511_v43 = vrot.slane %v510_v39, 1  ;;  %v529_v44 = vrot.slane %v528_v40, 1 }
 0x1fe   : > { %v502_v45 = vrot.slane %v501_v41, 1  ;;  %v520_v46 = vrot.slane %v519_v42, 1 }
 0x1ff   : > { %v512_v47 = vadd.f32 %v511_v43, %v510_v39  ;;  %v530_v48 = vadd.f32 %v529_v44, %v528_v40 }
 0x200   : > { %v503_v49 = vadd.f32 %v502_v45, %v501_v41  ;;  %v521_v50 = vadd.f32 %v520_v46, %v519_v42 }
 0x201   : > { %957 = vrsqrt.f32 %v512_v47  ;;  %vm540_vm4 = vcmp.eq.f32.partialorder %v512_v47, inf  ;;  %vm542_vm5 = vcmp.eq.f32.partialorder %v512_v47, 0.0  ;;  %v543_v54 = vand.u32 2147483648, %v512_v47 }
 0x202   : > { %959 = vrsqrt.f32 %v530_v48  ;;  %vm554_vm6 = vcmp.eq.f32.partialorder %v530_v48, inf  ;;  %vm556_vm7 = vcmp.eq.f32.partialorder %v530_v48, 0.0  ;;  %v557_v61 = vand.u32 2147483648, %v530_v48 }
 0x203   : > { %961 = vrsqrt.f32 %v503_v49  ;;  %vm533_vm8 = vcmp.eq.f32.partialorder %v503_v49, inf  ;;  %vm535_vm9 = vcmp.eq.f32.partialorder %v503_v49, 0.0  ;;  %v536_v5 = vand.u32 2147483648, %v503_v49 }
 0x204   : > { %963 = vrsqrt.f32 %v521_v50  ;;  %vm547_vm10 = vcmp.eq.f32.partialorder %v521_v50, inf  ;;  %v550_v12 = vand.u32 2147483648, %v521_v50  ;;  %vm549_vm11 = vcmp.eq.f32.partialorder %v521_v50, 0.0 }
 0x20b   : > { %v958_v51 = vpop.eup %957 }
 0x20c   : > { %v960_v52 = vpop.eup %959  ;;  %v539_v53 = vmul.f32 %v958_v51, %v512_v47 }
 0x20d   : > { %v962_v57 = vpop.eup %961  ;;  %v553_v58 = vmul.f32 %v960_v52, %v530_v48 }
 0x20e   : > { %v964_v62 = vpop.eup %963  ;;  %v541_v1 = vsel %vm540_vm4, %v512_v47, %v539_v53  ;;  %v532_v2 = vmul.f32 %v962_v57, %v503_v49 }
 0x20f   : > { %v544_v6 = vsel %vm542_vm5, %v543_v54, %v541_v1  ;;  %v555_v7 = vsel %vm554_vm6, %v530_v48, %v553_v58  ;;  %v546_v8 = vmul.f32 %v964_v62, %v521_v50 }
 0x210   : > { %v560_v9 = vadd.f32 1e-06, %v544_v6  ;;  %v558_v10 = vsel %vm556_vm7, %v557_v61, %v555_v7  ;;  %v534_v11 = vsel %vm533_vm8, %v503_v49, %v532_v2 }
 0x211   : > { %v562_v13 = vadd.f32 1e-06, %v558_v10  ;;  %v537_v14 = vsel %vm535_vm9, %v536_v5, %v534_v11  ;;  %v548_v15 = vsel %vm547_vm10, %v521_v50, %v546_v8 }
 0x212   : > { %965 = vrcp.f32 %v560_v9  ;;  %v559_v16 = vadd.f32 1e-06, %v537_v14  ;;  %v551_v17 = vsel %vm549_vm11, %v550_v12, %v548_v15 }
 0x213   : > { %967 = vrcp.f32 %v562_v13  ;;  %v561_v18 = vadd.f32 1e-06, %v551_v17 }
 0x214   : > { %969 = vrcp.f32 %v559_v16 }
 0x215   : > { %971 = vrcp.f32 %v561_v18 }
 0x21c   : > { %v966_v19 = vpop.eup %965 }
 0x21d   : > { %v968_v20 = vpop.eup %967  ;;  %v569_v21 = vmul.f32 %v966_v19, %v1460_v55  ;;  %v570_v22 = vmul.f32 %v966_v19, %v1476_v63 }
 0x21e   : > { %v970_v23 = vpop.eup %969  ;;  %v573_v24 = vmul.f32 %v968_v20, %v1462_v56  ;;  %v574_v25 = vmul.f32 %v968_v20, %v1478_v0 }
 0x21f   : > { %v972_v26 = vpop.eup %971  ;;  %v810_v27 = vpack.c.bf16 %v569_v21, %v569_v21  ;;  %v811_v28 = vpack.c.bf16 %v570_v22, %v570_v22  ;;  %v567_v29 = vmul.f32 %v970_v23, %v1468_v59  ;;  %v568_v55 = vmul.f32 %v970_v23, %v1484_v3 }
 0x220   : > { %v814_v63 = vpack.c.bf16 %v573_v24, %v573_v24  ;;  %v815_v30 = vpack.c.bf16 %v574_v25, %v574_v25  ;;  %v571_v56 = vmul.f32 %v972_v26, %v1470_v60  ;;  %v572_v0 = vmul.f32 %v972_v26, %v1486_v4 }
 0x221   : > { %610 = vst.msk [vmem:[%s1501_s25 + $0x8] sm:$0xf] %vm607_vm3, %v810_v27  ;;  %611 = vst.msk [vmem:[%s1501_s25 + $0xc] sm:$0xf] %vm607_vm3, %v811_v28  ;;  %v808_v31 = vpack.c.bf16 %v567_v29, %v567_v29  ;;  %v809_v59 = vpack.c.bf16 %v568_v55, %v568_v55 }
 0x222   : > { %614 = vst.msk [vmem:[%s1501_s25 + $0x18] sm:$0xf] %vm607_vm3, %v814_v63  ;;  %615 = vst.msk [vmem:[%s1501_s25 + $0x1c] sm:$0xf] %vm607_vm3, %v815_v30  ;;  %v812_v60 = vpack.c.bf16 %v571_v56, %v571_v56  ;;  %v813_v3 = vpack.c.bf16 %v572_v0, %v572_v0 }
 0x223   : > { %608 = vst.msk [vmem:[%s1501_s25] sm:$0xf] %vm607_vm3, %v808_v31  ;;  %609 = vst.msk [vmem:[%s1501_s25 + $0x4] sm:$0xf] %vm607_vm3, %v809_v59 }
 0x224   : > { %612 = vst.msk [vmem:[%s1501_s25 + $0x10] sm:$0xf] %vm607_vm3, %v812_v60  ;;  %613 = vst.msk [vmem:[%s1501_s25 + $0x14] sm:$0xf] %vm607_vm3, %v813_v3 }
 0x225   : > { %1100 = shalt.err (!%p1097_p0)
}
 0x226   : > { %s1101_s13 = scalar_lea.hbm %s1528_s24, 768  ;;  %s1105_s28 = scalar_lea.hbm %s1595_s4, 1536 }
 0x227   : > { %p1102_p4 = scmp.ne.s32.totalorder %s1528_s24, %s1101_s13  ;;  %p1106_p12 = scmp.lt.u32.totalorder %s1528_s24, %s1595_s4 }
 0x228   : > { %p1107_p1 = scmp.lt.u32.totalorder %s1105_s28, %s1101_s13  ;;  %p1109_p11 = scmp.lt.u32.totalorder %s1101_s13, %s1528_s24 }
 0x229   : > { %p1103_p2 = pnand %p1102_p4, %p1373_p10 }
 0x22a   : > { %p1108_p13 = por %p1107_p1, %p1106_p12 }
 0x22b   : > { %p1104_p8 = pneg %p1103_p2 }
 0x22c   : > { %p1110_p6 = por %p1109_p11, %p1108_p13 }
 0x22e   : > { %p1111_p3 = pnand %p1110_p6, %p1104_p8 }
 0x230   : > { %1114 = shalt.err (!%p1111_p3)
}
 0x231   : > { %s1189_s25 = smov 64   ;;  %s1190_s27 = smov 4  }
 0x232   : > { %859 = dma.vmem_to_hbm [thread:$0]  (%p1373_p10), %s1530_s5, 768, %s1528_s24, %s637_s14, %s1189_s25, %s1189_s25, %s1190_s27  }
 0x233 PF: > { %s1615_s18 = sld [smem:[#allocation15_spill]]  ;;  %s666_s7 = sand.u32 1, %s1157_s15  }
 0x234   : > { %p1617_p7 = scmp.ge.s32.totalorder %s1177_s20, 2  ;;  %s667_s26 = scalar_lea.sflag [#allocation4], %s666_s7 }
 0x239   : > { %p1616_p5 = scmp.ne.s32.totalorder %s1615_s18, 0 }
 0x23b   : > { %p876_p9 = pnand %p1617_p7, %p1616_p5 }
 0x23d   : > { %1152 = dma.done.wait (!%p876_p9), %s667_s26, 768  }
 0x23e   : > { %1154 = vsyncadd (!%p876_p9), %s667_s26, 4294966528  ;;  %s22_s20 = sadd.s32 1, %s1177_s20   ;;  %s1618_s15 = smov %s1161_s16 }
 0x23f   : > { %p19_p0 = scmp.ge.s32.totalorder %s22_s20, 4   ;;  %s1619_s16 = smov %s1165_s17 }
 0x240   : > { %s1620_s17 = smov %s1385_s22  ;;  %s1621_s18 = smov %s1173_s19 }
 0x241   : > { %s1622_s19 = smov %s1624_s11  ;;  %21 = sbr.rel (!%p19_p0) target bundleno = 8 (0x8), region = 93 }
 0x248   :  { %672 = vsyncpa [#allocation3], 1 }
 0x249   :  { %674 = vsyncpa [#allocation3 + $0x1], 1 }
 0x24a   :  { %675 = vsyncpa [#allocation6], 1 }
 0x24b   :  { %676 = vsyncpa [#allocation9], 1 }
 0x24c   :  { %677 = vsyncpa [#allocation4], 1 }
 0x24d   :  { %679 = vsyncpa [#allocation4 + $0x1], 1 }

// kernel: dpsa1d_forward.3
= control target key start
LH: loop header
LB: loop body
LE: loop exit
PB: predicated region body
PF: predicated region fallthrough
CT: control target
= control target key end

     0   :  { %s1679_s0 = inlined_call_operand.hbm [shape: bf16[2,6,16,16], index: 0, kind: input, shape index: {}]   ;;  %s1680_s1 = inlined_call_operand.hbm [shape: bf16[2,2,16,4], index: 1, kind: input, shape index: {}]   ;;  %s1681_s2 = inlined_call_operand.hbm [shape: bf16[2,2,16,4], index: 2, kind: input, shape index: {}]   ;;  %s1682_s3 = inlined_call_operand.hbm [shape: bf16[16,32], index: 3, kind: input, shape index: {}]   ;;  %s1683_s4 = inlined_call_operand.hbm [shape: f32[16,1], index: 4, kind: input, shape index: {}]   ;;  %s1684_s5 = inlined_call_operand.hbm [shape: f32[2,16,16], index: 5, kind: output, shape index: {}]  }
   0x1   :  { %1714 = sst [smem:[#allocation27_spill]] %s1680_s1 }
   0x2   :  { %1715 = sst [smem:[#allocation28_spill]] %s1682_s3 }
   0x3   :  { %1716 = sst [smem:[#allocation29_spill]] %s1684_s5 }
   0x4   :  { %10 = vsyncpa [#allocation4], 0 }
   0x5   :  { %12 = vsyncpa [#allocation4 + $0x1], 0 }
   0x6   :  { %13 = vsyncpa [#allocation7], 0 }
   0x7   :  { %15 = vsyncpa [#allocation7 + $0x1], 0 }
   0x8   :  { %16 = vsyncpa [#allocation10], 0 }
   0x9   :  { %17 = vsyncpa [#allocation5], 0 }
   0xa   :  { %19 = vsyncpa [#allocation5 + $0x1], 0  ;;  %s1292_s18 = smov 0   ;;  %s1294_s19 = smov 0  }
   0xb   :  { %s1296_s20 = smov 0   ;;  %s1298_s21 = smov 0  }
   0xc   :  { %s1300_s22 = smov 0   ;;  %s1302_s23 = smov 0  }
   0xd   :  { %s1304_s24 = smov 0   ;;  %s1306_s25 = smov 0  }
   0xe LB: > { %1717 = sst [smem:[#allocation17_spill]] %s1215_s18  ;;  %s1333_s26 = sadd.s32 4294967295, %s1243_s25   ;;  %s1243_s25 = sphi %s1306_s25, %s25_s25   ;;  %s1239_s24 = sphi %s1304_s24, %s1771_s24   ;;  %s1235_s23 = sphi %s1302_s23, %s1765_s23   ;;  %s1231_s22 = sphi %s1300_s22, %s1770_s22   ;;  %s1227_s21 = sphi %s1298_s21, %s1764_s21   ;;  %s1223_s20 = sphi %s1296_s20, %s1769_s20   ;;  %s1219_s19 = sphi %s1294_s19, %s1768_s19   ;;  %s1215_s18 = sphi %s1292_s18, %s1767_s18  }
   0xf   : > { %1718 = sst [smem:[#allocation18_spill]] %s1227_s21  ;;  %s784_s27 = sadd.s32 4294967294, %s1243_s25  }
  0x10   : > { %1719 = sst [smem:[#allocation19_spill]] %s1231_s22  ;;  %p60_p0 = scmp.ne.s32.totalorder %s1223_s20, %s1219_s19 }
  0x11   : > { %1720 = sst [smem:[#allocation20_spill]] %s1235_s23  ;;  %p61_p1 = scmp.eq.s32.totalorder %s1243_s25, 0 }
  0x12   : > { %1721 = sst [smem:[#allocation21_spill]] %s1243_s25  ;;  %p66_p2 = scmp.ne.s32.totalorder %s1219_s19, %s1215_s18 }
  0x13   : > { %1722 = sst [smem:[#allocation22_spill]] %s1333_s26  ;;  %p1686_p3 = scmp.eq.s32.totalorder %s1333_s26, 0 }
  0x14   : > { %p186_p4 = scmp.eq.s32.totalorder %s1333_s26, 3  ;;  %p1344_p5 = por %p61_p1, %p60_p0 }
  0x15   : > { %p192_p6 = scmp.eq.s32.totalorder %s784_s27, 3  ;;  %p1350_p7 = por %p1686_p3, %p66_p2 }
  0x16   : > { %s1723_s29 = scalar_select %p1344_p5, 1, 0 }
  0x17   : > { %s1724_s30 = scalar_select %p1350_p7, 1, 0 }
  0x18   : > { %p1354_p8 = por %p186_p4, %p60_p0  ;;  %p1358_p9 = por %p192_p6, %p66_p2 }
  0x19   : > { %p785_p10 = scmp.ge.s32.totalorder %s1243_s25, 1  ;;  %p199_p11 = scmp.lt.s32.totalorder %s1243_s25, 5 }
  0x1a   : > { %s1725_s6 = scalar_select %p1354_p8, 1, 0 }
  0x1b   : > { %s1727_s7 = scalar_select %p1358_p9, 1, 0 }
  0x1c   : > { %1726 = sst [smem:[#allocation23_spill]] %s1725_s6  ;;  %p1364_p12 = pnand %p785_p10, %p199_p11 }
  0x1d   : > { %1728 = sst [smem:[#allocation24_spill]] %s1727_s7  ;;  %s1245_s9 = smov [#allocation9]  }
  0x1e   : > { %s1729_s8 = scalar_select %p1364_p12, 1, 0 }
  0x1f   : > { %s211_s10 = sshll.u32 %s1245_s9, 4  ;;  %p873_p13 = pneg %p1364_p12  ;;  %s212_s10 = int_to_ptr.vmem [resolvable:$true] %s211_s10 }
  0x20   : > { %s44_s12 = sadd.s32 1, %s1239_s24  ;;  %s37_s13 = sadd.s32 1, %s1235_s23 }
  0x21   : > { %p1372_p0 = pnand %p873_p13, %p1686_p3  ;;  %s1731_s3 = sld [smem:[#allocation28_spill]] }
  0x23   : > { %s1730_s11 = scalar_select %p1372_p0, 1, 0 }
  0x24   : > { %p1698_p2 = pneg %p1372_p0 }
  0x27   : > { %s991_s16 = scalar_lea.hbm %s1731_s3, 128 }
  0x28   : > { %p992_p1 = scmp.ne.s32.totalorder %s1731_s3, %s991_s16  ;;  %p998_p10 = scmp.lt.u32.totalorder %s991_s16, %s1731_s3 }
  0x2a   : > { %p994_p4 = pnand %p1698_p2, %p992_p1 }
  0x2c   : > { %p995_p6 = pneg %p994_p4 }
  0x2e   : > { %p1000_p11 = pnand %p998_p10, %p995_p6 }
  0x30   : > { %1003 = shalt.err (!%p1000_p11)
}
  0x31   : > { %s1004_s23 = scalar_lea.vmem %s212_s10, 128  ;;  %p1012_p8 = scmp.lt.s32.totalorder %s212_s10, %s212_s10 }
  0x32   : > { %p1005_p13 = scmp.ne.s32.totalorder %s212_s10, %s1004_s23  ;;  %p1013_p7 = scmp.lt.s32.totalorder %s1004_s23, %s1004_s23 }
  0x34   : > { %p1007_p3 = pnand %p1005_p13, %p1698_p2  ;;  %p1014_p12 = por %p1013_p7, %p1012_p8 }
  0x36   : > { %p1008_p9 = pneg %p1007_p3 }
  0x38   : > { %p1015_p5 = pnand %p1014_p12, %p1008_p9 }
  0x3a   : > { %1018 = shalt.err (!%p1015_p5)
}
  0x3b   : > { %s1690_s14 = smov 64   ;;  %s1692_s28 = smov 4  }
  0x3c   : > { %876 = dma.hbm_to_vmem [thread:$0]  (!%p1372_p0), %s1731_s3, 128, %s212_s10, [#allocation10], %s1690_s14, %s1690_s14, %s1692_s28  }
  0x3d   : > { %p38_p3 = scmp.ge.s32.totalorder %s37_s13, 2  ;;  %p896_p5 = scmp.lt.s32.totalorder %s1243_s25, 4 }
  0x3e   : > { %s1694_s16 = sand.u32 1, %s1223_s20   ;;  %s260_s17 = sand.u32 1, %s1243_s25  }
  0x3f   : > { %s1773_s13 = smov (%p38_p3, %s37_s13), 0  ;;  %s1775_s12 = smov (!%p38_p3, %s44_s12), %s1239_s24 }
  0x40   : > { %1732 = sst [smem:[#allocation25_spill]] %s1773_s13  ;;  %s1411_s27 = sshll.u32 %s1694_s16, 4 }
  0x41   : > { %p1733_p7 = scmp.ne.s32.totalorder %s1723_s29, 0  ;;  %p46_p9 = scmp.ge.s32.totalorder %s1775_s12, 2 }
  0x42   : > { %s1696_s10 = sshll.u32 %s1239_s24, 8  ;;  %s264_s15 = scalar_lea.vmem [#allocation6], %s1411_s27 }
  0x43   : > { %p1415_p8 = pnand %p896_p5, %p1733_p7  ;;  %s1777_s12 = smov (%p46_p9, %s1775_s12), 0 }
  0x44   : > { %1735 = sst [smem:[#allocation26_spill]] %s1777_s12  ;;  %s271_s23 = sshll.u32 %s264_s15, 4  ;;  %s1436_s23 = int_to_ptr.vmem [resolvable:$true] %s271_s23 }
  0x45   : > { %s1734_s9 = scalar_select %p1415_p8, 1, 0 }
  0x46   : > { %s48_s14 = ssub.s32 %s1239_s24, %s1777_s12  ;;  %s1736_s1 = sld [smem:[#allocation27_spill]] }
  0x47   : > { %p1432_p12 = scmp.eq.s32.totalorder %s48_s14, 0  ;;  %s1438_s13 = scalar_lea.sflag [#allocation7], %s260_s17 }
  0x48   : > { %p1444_p4 = pneg %p1415_p8 }
  0x49   : > { %s1737_s29 = scalar_select %p1432_p12, 1, 0 }
  0x4a   : > { %s1738_s12 = scalar_select %p1444_p4, 1, 0 }
  0x4c   : > { %s1430_s16 = scalar_lea.hbm %s1736_s1, %s1696_s10  ;;  %s1024_s28 = scalar_lea.hbm %s1736_s1, 512 }
  0x4d   : > { %s1019_s15 = scalar_lea.hbm %s1430_s16, 256  ;;  %p1025_p11 = scmp.lt.u32.totalorder %s1430_s16, %s1736_s1 }
  0x4e   : > { %p1020_p1 = scmp.ne.s32.totalorder %s1430_s16, %s1019_s15  ;;  %p1026_p13 = scmp.lt.u32.totalorder %s1024_s28, %s1019_s15 }
  0x4f   : > { %p1028_p5 = scmp.lt.u32.totalorder %s1019_s15, %s1430_s16 }
  0x50   : > { %p1022_p6 = pnand %p1444_p4, %p1020_p1  ;;  %p1027_p3 = por %p1026_p13, %p1025_p11 }
  0x52   : > { %p1023_p10 = pneg %p1022_p6  ;;  %p1029_p7 = por %p1028_p5, %p1027_p3 }
  0x54   : > { %p1030_p9 = pnand %p1029_p7, %p1023_p10 }
  0x56   : > { %1033 = shalt.err (!%p1030_p9)
}
  0x57   : > { %s1034_s17 = scalar_lea.vmem %s1436_s23, 256  ;;  %s1248_s3 = smov [#allocation6]  }
  0x58   : > { %p1035_p1 = scmp.ne.s32.totalorder %s1436_s23, %s1034_s17  ;;  %s1039_s14 = sshll.u32 %s1248_s3, 4  ;;  %s1040_s14 = int_to_ptr.vmem [resolvable:$false] %s1039_s14 }
  0x59   : > { %s1041_s7 = scalar_lea.vmem %s1040_s14, 512  ;;  %p1042_p0 = scmp.lt.s32.totalorder %s1436_s23, %s1040_s14 }
  0x5a   : > { %p1037_p6 = pnand %p1035_p1, %p1444_p4  ;;  %p1043_p12 = scmp.lt.s32.totalorder %s1041_s7, %s1034_s17 }
  0x5c   : > { %p1038_p2 = pneg %p1037_p6  ;;  %p1044_p11 = por %p1043_p12, %p1042_p0 }
  0x5e   : > { %p1045_p13 = pnand %p1044_p11, %p1038_p2 }
  0x60   : > { %1048 = shalt.err (!%p1045_p13)
}
  0x61   : > { %s1739_s10 = smov 4   ;;  %s1740_s15 = smov 64  }
  0x62   : > { %886 = dma.hbm_to_vmem [thread:$0]  (!%p1415_p8), %s1430_s16, 256, %s1436_s23, %s1438_s13, %s1740_s15, %s1740_s15, %s1739_s10  }
  0x63   : > { %s1741_s28 = sadd.s32 1, %s1223_s20  ;;  %p1742_p10 = scmp.ne.s32.totalorder %s1737_s29, 0 }
  0x64   : > { %s1743_s3 = sshll.u32 %s1239_s24, 8  ;;  %s1249_s18 = smov [#allocation11]  }
  0x65   : > { %s1476_s17 = scalar_select %p1742_p10, %s1223_s20, %s1741_s28  }
  0x66   : > { %s1483_s1 = scalar_lea.hbm %s1681_s2, %s1743_s3  ;;  %s224_s25 = sshll.u32 %s1249_s18, 4  ;;  %s225_s25 = int_to_ptr.vmem [resolvable:$true] %s224_s25 }
  0x67   : > { %s1049_s22 = scalar_lea.hbm %s1683_s4, 256  ;;  %p1744_p2 = scmp.ne.s32.totalorder %s1730_s11, 0 }
  0x68   : > { %p1050_p0 = scmp.ne.s32.totalorder %s1683_s4, %s1049_s22  ;;  %p1056_p7 = scmp.lt.u32.totalorder %s1049_s22, %s1683_s4 }
  0x69   : > { %p1745_p12 = pneg %p1744_p2 }
  0x6b   : > { %p1052_p3 = pnand %p1050_p0, %p1745_p12 }
  0x6d   : > { %p1053_p5 = pneg %p1052_p3 }
  0x6f   : > { %p1058_p9 = pnand %p1056_p7, %p1053_p5 }
  0x71   : > { %1061 = shalt.err (!%p1058_p9)
}
  0x72   : > { %s1062_s18 = scalar_lea.vmem %s225_s25, 256  ;;  %p1746_p6 = pmov %p1745_p12 }
  0x73   : > { %p1063_p1 = scmp.ne.s32.totalorder %s225_s25, %s1062_s18  ;;  %p1070_p10 = scmp.lt.s32.totalorder %s225_s25, %s225_s25 }
  0x74   : > { %p1071_p8 = scmp.lt.s32.totalorder %s1062_s18, %s1062_s18 }
  0x75   : > { %p1065_p11 = pnand %p1063_p1, %p1746_p6 }
  0x76   : > { %p1072_p4 = por %p1071_p8, %p1070_p10 }
  0x77   : > { %p1066_p13 = pneg %p1065_p11 }
  0x79   : > { %p1073_p0 = pnand %p1072_p4, %p1066_p13 }
  0x7b   : > { %1076 = shalt.err (!%p1073_p0)
}
  0x7c   : > { %s1250_s5 = smov 128   ;;  %s1251_s21 = smov 8  }
  0x7d   : > { %879 = dma.hbm_to_vmem [thread:$0]  (!%p1744_p2), %s1683_s4, 256, %s225_s25, [#allocation10], %s1250_s5, %s1250_s5, %s1251_s21  }
  0x7e   : > { %s856_s6 = smul.u32 768, %s1239_s24  ;;  %s242_s29 = scalar_lea.vmem [#allocation3], %s1411_s27 }
  0x7f   : > { %s250_s28 = sshll.u32 %s242_s29, 4  ;;  %s285_s16 = scalar_lea.vmem [#allocation8], %s1411_s27  ;;  %s1507_s28 = int_to_ptr.vmem [resolvable:$true] %s250_s28 }
  0x80   : > { %s1512_s7 = scalar_lea.hbm %s1679_s0, %s856_s6  ;;  %s1515_s11 = sshll.u32 %s285_s16, 4  ;;  %s1547_s11 = int_to_ptr.vmem [resolvable:$true] %s1515_s11 }
  0x81   : > { %s1747_s23 = sand.u32 1, %s1223_s20   ;;  %s1077_s25 = scalar_lea.hbm %s1512_s7, 256 }
  0x82   : > { %s1519_s18 = scalar_lea.sflag [#allocation4], %s1747_s23  ;;  %p1078_p8 = scmp.ne.s32.totalorder %s1512_s7, %s1077_s25 }
  0x83   : > { %p1748_p4 = scmp.ne.s32.totalorder %s1738_s12, 0  ;;  %s1082_s22 = scalar_lea.hbm %s1679_s0, 1536 }
  0x84   : > { %p1083_p3 = scmp.lt.u32.totalorder %s1512_s7, %s1679_s0  ;;  %p1084_p5 = scmp.lt.u32.totalorder %s1082_s22, %s1077_s25 }
  0x85   : > { %p1080_p2 = pnand %p1078_p8, %p1748_p4  ;;  %p1086_p9 = scmp.lt.u32.totalorder %s1077_s25, %s1512_s7 }
  0x86   : > { %p1085_p7 = por %p1084_p5, %p1083_p3 }
  0x87   : > { %p1081_p12 = pneg %p1080_p2 }
  0x88   : > { %p1087_p1 = por %p1086_p9, %p1085_p7 }
  0x8a   : > { %p1088_p6 = pnand %p1087_p1, %p1081_p12 }
  0x8c   : > { %1091 = shalt.err (!%p1088_p6)
}
  0x8d   : > { %s1092_s27 = scalar_lea.vmem %s1507_s28, 256  ;;  %s1252_s29 = smov [#allocation3]  }
  0x8e   : > { %p1093_p11 = scmp.ne.s32.totalorder %s1507_s28, %s1092_s27  ;;  %s1097_s3 = sshll.u32 %s1252_s29, 4  ;;  %s1098_s3 = int_to_ptr.vmem [resolvable:$false] %s1097_s3 }
  0x8f   : > { %s1099_s14 = scalar_lea.vmem %s1098_s3, 512  ;;  %p1100_p0 = scmp.lt.s32.totalorder %s1507_s28, %s1098_s3 }
  0x90   : > { %p1095_p13 = pnand %p1093_p11, %p1748_p4  ;;  %p1101_p8 = scmp.lt.s32.totalorder %s1099_s14, %s1092_s27 }
  0x92   : > { %p1096_p10 = pneg %p1095_p13  ;;  %p1102_p2 = por %p1101_p8, %p1100_p0 }
  0x94   : > { %p1103_p3 = pnand %p1102_p2, %p1096_p10 }
  0x96   : > { %1106 = shalt.err (!%p1103_p3)
}
  0x97   : > { %p1749_p12 = scmp.ne.s32.totalorder %s1734_s9, 0  ;;  %s1107_s16 = scalar_lea.hbm %s1483_s1, 256 }
  0x98   : > { %p1108_p5 = scmp.ne.s32.totalorder %s1483_s1, %s1107_s16  ;;  %s1112_s5 = scalar_lea.hbm %s1681_s2, 512 }
  0x99   : > { %883 = dma.hbm_to_vmem [thread:$0]  (!%p1749_p12), %s1512_s7, 256, %s1507_s28, %s1519_s18, %s1740_s15, %s1740_s15, %s1739_s10  }
  0x9a   : > { %p1110_p7 = pnand %p1108_p5, %p1748_p4  ;;  %p1113_p1 = scmp.lt.u32.totalorder %s1483_s1, %s1681_s2 }
  0x9b   : > { %p1114_p6 = scmp.lt.u32.totalorder %s1112_s5, %s1107_s16  ;;  %p1116_p13 = scmp.lt.u32.totalorder %s1107_s16, %s1483_s1 }
  0x9c   : > { %p1111_p9 = pneg %p1110_p7 }
  0x9d   : > { %p1115_p11 = por %p1114_p6, %p1113_p1 }
  0x9f   : > { %p1117_p10 = por %p1116_p13, %p1115_p11 }
  0xa1   : > { %p1118_p0 = pnand %p1117_p10, %p1111_p9 }
  0xa3   : > { %1121 = shalt.err (!%p1118_p0)
}
  0xa4   : > { %s1122_s28 = scalar_lea.vmem %s1547_s11, 256  ;;  %s1253_s7 = smov [#allocation8]  }
  0xa5   : > { %p1123_p8 = scmp.ne.s32.totalorder %s1547_s11, %s1122_s28  ;;  %s1127_s18 = sshll.u32 %s1253_s7, 4  ;;  %s1128_s18 = int_to_ptr.vmem [resolvable:$false] %s1127_s18 }
  0xa6   : > { %s1129_s26 = scalar_lea.vmem %s1128_s18, 512  ;;  %p1130_p5 = scmp.lt.s32.totalorder %s1547_s11, %s1128_s18 }
  0xa7   : > { %p1125_p2 = pnand %p1123_p8, %p1748_p4  ;;  %p1131_p7 = scmp.lt.s32.totalorder %s1129_s26, %s1122_s28 }
  0xa9   : > { %p1126_p3 = pneg %p1125_p2  ;;  %p1132_p1 = por %p1131_p7, %p1130_p5 }
  0xab   : > { %p1133_p6 = pnand %p1132_p1, %p1126_p3 }
  0xad   : > { %1136 = shalt.err (!%p1133_p6)
}
  0xae   : > { %889 = dma.hbm_to_vmem [thread:$0]  (!%p1749_p12), %s1483_s1, 256, %s1547_s11, %s1438_s13, %s1740_s15, %s1740_s15, %s1739_s10  }
  0xaf   : > { %p1750_p4 = scmp.ne.s32.totalorder %s1729_s8, 0 }
  0xb0   : > { %s1577_s12 = sand.u32 (!%p1750_p4), 1, %s1219_s19   ;;  %p1751_p9 = scmp.ne.s32.totalorder (!%p1750_p4), %s1724_s30, 0 }
  0xb1   : > { %304 = sbr.rel (%p1750_p4) target bundleno = 1178 (0x49a), region = 40  ;;  %s1580_s6 = sshll.u32 (!%p1750_p4), %s1577_s12, 4 }
  0xb2   : > { %s307_s9 = scalar_lea.sflag (!%p1750_p4), [#allocation4], %s1577_s12  ;;  %s310_s27 = scalar_lea.vmem (!%p1750_p4), [#allocation3], %s1580_s6 }
  0xb8   : > { %1198 = dma.done.wait (%p1751_p9), %s307_s9, 256  }
  0xb9   : > { %1200 = vsyncadd (%p1751_p9), %s307_s9, 4294967040  ;;  %s1752_s1 = sld [smem:[#allocation22_spill]]  ;;  %s319_s10 = scalar_lea.vmem [#allocation6], %s1580_s6 }
  0xbf   : > { %s315_s8 = sand.u32 1, %s1752_s1  }
  0xc0   : > { %s316_s13 = scalar_lea.sflag [#allocation7], %s315_s8 }
  0xc1   : > { %1202 = dma.done.wait (%p1751_p9), %s316_s13, 512  }
  0xc2   : > { %1204 = vsyncadd (%p1751_p9), %s316_s13, 4294966784  ;;  %s328_s15 = scalar_lea.vmem [#allocation8], %s1580_s6  ;;  %p1753_p12 = scmp.eq.s32.totalorder %s1752_s1, 0 }
  0xc4   : > { %1206 = dma.done.wait (%p1753_p12), [#allocation10], 384   ;;  %p1754_p11 = pmov %p1753_p12 }
  0xc5   : > { %s1755_s11 = sld [smem:[#allocation18_spill]]  ;;  %v1254_v0 = vmov 0.0   ;;  %vm1255_vm0 = vmmov 0   ;;  %vm415_vm1 = vcmask 130048   ;;  %vm464_vm2 = vcmask 31744   ;;  %s1611_s21 = scalar_lea.vmem [#allocation12], %s1580_s6 }
  0xc6   : > { %1208 = vsyncadd (%p1754_p11), [#allocation10], 4294966912  ;;  %836 = vmatprep.subr.bf16.mxu0 %v1254_v0  ;;  %842 = vmatprep.subr.bf16.mxu1 %v1254_v0 }
  0xc7   : > { %838 = vmatprep.mubr.msk.bf16.mxu0 %vm1255_vm0, %v1254_v0  ;;  %844 = vmatprep.mubr.msk.bf16.mxu1 %vm1255_vm0, %v1254_v0 }
  0xcb   : > { %s825_s29 = sshll.u32 %s1755_s11, 3  ;;  %s813_s16 = sshll.u32 %s1755_s11, 4 }
  0xcc   : > { %s376_s3 = scalar_lea.vmem %s310_s27, %s825_s29 [#allocation3]  ;;  %s1600_s14 = scalar_lea.vmem %s328_s15, %s825_s29 [#allocation8] }
  0xcd   : > { %s380_s30 = scalar_lea.vmem %s319_s10, %s825_s29 [#allocation6]  ;;  %v978_v1 = vld [vmem:[%s376_s3] sm:$0xff]   ;;  %s530_s23 = sshra.s32 %s813_s16, 4 }
  0xce   : > { %v979_v2 = vld [vmem:[%s380_s30] sm:$0xff]   ;;  %393 = vxpose.xlu0.c.b16.start.end [1/1] (short) (narrow) %v978_v1, 16  ;;  %s814_s25 = sshll.u32 %s530_s23, 3  ;;  %p815_p13 = scmp.ne.s32.totalorder %s1755_s11, 1 }
  0xcf   : > { %837 = vmatpush3.bf16.msra.mxu0 %v979_v2  ;;  %v980_v22 = vld [vmem:[%s1600_s14] sm:$0xff]   ;;  %s533_s5 = scalar_lea.vmem [#allocation2], %s814_s25  ;;  %v1256_v29 = vmov (!%p815_p13), 0.0   ;;  %vm1257_vm3 = vmmov (!%p815_p13), 0   ;;  %v543_v30 = vld [vmem:[#allocation11] sm:$0xff] (!%p815_p13)  ;;  %v1258_v31 = vmov (!%p815_p13), 0  }
  0xd0   : > { %848 = vmatprep.subr.bf16.mxu0 (!%p815_p13), %v1256_v29  ;;  %v544_v33 = vld [vmem:[#allocation11 + $0x8] sm:$0xff] (!%p815_p13)  ;;  %v990_v34 = vld [vmem:[#allocation9] sm:$0xff] (!%p815_p13)   ;;  %vm560_vm4 = vcmask (!%p815_p13), 261120  }
  0xd7   : > { %989 = vset.pattern.permute.xlu0 (!%p815_p13), %v1258_v31 }
 0x134   : > { %v401_v3 = vpop.trf.xlu0 }
 0x135   : > { %839 = vmatmul.mubr.msk.bf16.vlgmr.msra.gmra.mrb[0].mxu0 %vm415_vm1, %v401_v3 }
 0x136   : > { %852 = vmatprep.mubr.msk.bf16.mxu0 (!%p815_p13), %vm1257_vm3, %v1256_v29 }
 0x208   : > { %v453_v4 = vpop.f32.mrb[0].mxu0 }
 0x209   : > { %v460_v5 = vmul.f32 1.442695, %v453_v4  ;;  %v840_v6 = vpop.f32.mrb[1].mxu0 }
 0x20a   : > { %v456_v7 = vpop.f32.mrb[2].mxu0 }
 0x20b   : > { %981 = vpow2.f32 %v460_v5  ;;  %v462_v8 = vmul.f32 1.442695, %v456_v7  ;;  %v841_v9 = vpop.f32.mrb[3].mxu0 }
 0x20d   : > { %983 = vpow2.f32 %v462_v8 }
 0x215   : > { %v982_v10 = vpop.eup %981 }
 0x216   : > { %v465_v11 = vsel %vm464_vm2, %v982_v10, 0.0 }
 0x217   : > { %v984_v12 = vpop.eup %983  ;;  %466 = vadd.xlane.f32.xlu0 %v465_v11 }
 0x218   : > { %v468_v13 = vsel %vm464_vm2, %v984_v12, 0.0 }
 0x219   : > { %469 = vadd.xlane.f32.xlu1 %v468_v13 }
 0x22d   : > { %547 = vperm.xlu0 (!%p815_p13), %989, %v543_v30  }
 0x231   : > { %552 = vperm.xlu0 (!%p815_p13), %989, %v544_v33  }
 0x2a4   : > { %v467_v14 = vpop.xlane.xlu0 %466 }
 0x2a5   : > { %985 = vrcp.f32 %v467_v14 }
 0x2a6   : > { %v470_v15 = vpop.xlane.xlu1 %469 }
 0x2a7   : > { %987 = vrcp.f32 %v470_v15 }
 0x2ac   : > { %v548_v35 = vpop.permute.xlu0 (!%p815_p13), %547 }
 0x2af   : > { %v986_v16 = vpop.eup %985 }
 0x2b0   : > { %v473_v18 = vmul.f32 %v986_v16, %v982_v10  ;;  %v553_v39 = vpop.permute.xlu0 (!%p815_p13), %552 }
 0x2b1   : > { %v988_v17 = vpop.eup %987 }
 0x2b2   : > { %v474_v19 = vmul.f32 %v988_v17, %v984_v12 }
 0x2b4   : > { %v475_v20 = vpack.c.bf16 %v474_v19, %v473_v18 }
 0x2b6   : > { %v485_v21 = vsel %vm464_vm2, %v475_v20, 0 }
 0x2b7   : > { %843 = vmatpush3.bf16.xpose.msra.mxu1 %v485_v21 }
 0x2be   : > { %845 = vmatmul.mubr.msk.bf16.vlgmr.msra.gmra.mrb[0].mxu1 %vm464_vm2, %v980_v22 }
 0x390   : > { %538 = sbr.rel (%p815_p13) target bundleno = 1150 (0x47e), region = 64 }
 0x391   : > { %v521_v23 = vpop.f32.mrb[0].mxu1 }
 0x392   : > { %v846_v24 = vpop.f32.mrb[1].mxu1 }
 0x393   : > { %v524_v25 = vpop.f32.mrb[2].mxu1 }
 0x394   : > { %v529_v26 = vpack.c.bf16 %v524_v25, %v521_v23  ;;  %v847_v27 = vpop.f32.mrb[3].mxu1 }
 0x396   : > { %534 = vst.msk [vmem:[%s533_s5] sm:$0xff] %vm415_vm1, %v529_v26 }
 0x39d   : > { %v541_v28 = vld [vmem:[#allocation2] sm:$0xff]  ;;  %v542_v32 = vld [vmem:[#allocation2 + $0x8] sm:$0xff] }
 0x39e   : > { %849 = vmatpush3.bf16.msra.mxu0 %v541_v28 }
 0x39f   : > { %850 = vmatprep.subr.bf16.mxu0 %v1256_v29 }
 0x3a2   : > { %851 = vmatpush3.bf16.msra.mxu0 %v542_v32 }
 0x3a5   : > { %853 = vmatmul.mubr.msk.bf16.vlgmr.msra.gmra.mrb[0].mxu0 %vm560_vm4, %v990_v34 }
 0x478   : > { %v598_v36 = vpop.f32.mrb[0].mxu0 }
 0x479   : > { %v599_v37 = vadd.f32 %v598_v36, %v548_v35  ;;  %v854_v38 = vpop.f32.mrb[1].mxu0 }
 0x47a   : > { %v601_v40 = vpop.f32.mrb[2].mxu0 }
 0x47b   : > { %605 = vst.msk [vmem:[%s1611_s21] sm:$0xff] %vm415_vm1, %v599_v37  ;;  %v602_v41 = vadd.f32 %v601_v40, %v553_v39  ;;  %v855_v42 = vpop.f32.mrb[3].mxu0 }
 0x47d   : > { %606 = vst.msk [vmem:[%s1611_s21 + $0x8] sm:$0xff] %vm415_vm1, %v602_v41 }
 0x47e PF: > { %s1756_s22 = sld [smem:[#allocation19_spill]]  ;;  %s1757_s28 = sld [smem:[#allocation23_spill]] }
 0x47f   : > { %s1758_s6 = sld [smem:[#allocation29_spill]]  ;;  %s622_s27 = sshll.u32 %s1611_s21, 4  ;;  %s1625_s27 = int_to_ptr.vmem [resolvable:$true] %s622_s27 }
 0x480   : > { %s608_s1 = scalar_lea.sflag [#allocation5], %s1577_s12  ;;  %s1137_s8 = scalar_lea.vmem %s1625_s27, 256 }
 0x481   : > { %p1138_p10 = scmp.ne.s32.totalorder %s1625_s27, %s1137_s8  ;;  %s1259_s13 = smov [#allocation12]  }
 0x482   : > { %s1141_s10 = sshll.u32 %s1259_s13, 4  ;;  %s1142_s10 = int_to_ptr.vmem [resolvable:$false] %s1141_s10 }
 0x483   : > { %s1143_s15 = scalar_lea.vmem %s1142_s10, 512  ;;  %p1144_p3 = scmp.lt.s32.totalorder %s1625_s27, %s1142_s10 }
 0x484   : > { %s828_s7 = sshll.u32 %s1756_s22, 8  ;;  %p1759_p0 = scmp.ne.s32.totalorder %s1757_s28, 0 }
 0x485   : > { %s1622_s9 = scalar_lea.hbm %s1758_s6, %s828_s7  ;;  %p1145_p5 = scmp.lt.s32.totalorder %s1143_s15, %s1137_s8 }
 0x486   : > { %p1139_p8 = pnand %p1138_p10, %p1759_p0 }
 0x487   : > { %p1146_p7 = por %p1145_p5, %p1144_p3 }
 0x488   : > { %p1140_p2 = pneg %p1139_p8 }
 0x48a   : > { %p1147_p1 = pnand %p1146_p7, %p1140_p2 }
 0x48c   : > { %1150 = shalt.err (!%p1147_p1)
}
 0x48d   : > { %s1151_s11 = scalar_lea.hbm %s1622_s9, 256  ;;  %s1155_s14 = scalar_lea.hbm %s1758_s6, 512 }
 0x48e   : > { %p1152_p6 = scmp.ne.s32.totalorder %s1622_s9, %s1151_s11  ;;  %p1156_p12 = scmp.lt.u32.totalorder %s1622_s9, %s1758_s6 }
 0x48f   : > { %p1157_p11 = scmp.lt.u32.totalorder %s1155_s14, %s1151_s11  ;;  %p1159_p10 = scmp.lt.u32.totalorder %s1151_s11, %s1622_s9 }
 0x490   : > { %p1153_p4 = pnand %p1152_p6, %p1759_p0 }
 0x491   : > { %p1158_p13 = por %p1157_p11, %p1156_p12 }
 0x492   : > { %p1154_p9 = pneg %p1153_p4 }
 0x493   : > { %p1160_p8 = por %p1159_p10, %p1158_p13 }
 0x495   : > { %p1161_p2 = pnand %p1160_p8, %p1154_p9 }
 0x497   : > { %1164 = shalt.err (!%p1161_p2)
}
 0x498   : > { %s1260_s23 = smov 128   ;;  %s1261_s25 = smov 8  }
 0x499   : > { %871 = dma.vmem_to_hbm [thread:$0]  (%p1759_p0), %s1625_s27, 256, %s1622_s9, %s608_s1, %s1260_s23, %s1260_s23, %s1261_s25  }
 0x49a PF: > { %s1760_s5 = sld [smem:[#allocation21_spill]]  ;;  %s1761_s21 = sld [smem:[#allocation17_spill]] }
 0x49b   : > { %s1762_s22 = sld [smem:[#allocation24_spill]] }
 0x4a0   : > { %p899_p3 = scmp.ge.s32.totalorder %s1760_s5, 2  ;;  %s637_s7 = sand.u32 1, %s1761_s21  }
 0x4a1   : > { %p1763_p5 = scmp.ne.s32.totalorder %s1762_s22, 0  ;;  %s638_s18 = scalar_lea.sflag [#allocation5], %s637_s7 }
 0x4a3   : > { %p891_p7 = pnand %p899_p3, %p1763_p5 }
 0x4a5   : > { %1210 = dma.done.wait (!%p891_p7), %s638_s18, 256  }
 0x4a6   : > { %1212 = vsyncadd (!%p891_p7), %s638_s18, 4294967040  ;;  %s25_s25 = sadd.s32 1, %s1760_s5   ;;  %s1764_s21 = sld [smem:[#allocation20_spill]] }
 0x4a7   : > { %p22_p1 = scmp.ge.s32.totalorder %s25_s25, 6   ;;  %s1765_s23 = sld [smem:[#allocation25_spill]] }
 0x4a8   : > { %s1766_s12 = sld [smem:[#allocation26_spill]]  ;;  %s1767_s18 = smov %s1219_s19 }
 0x4a9   : > { %s1768_s19 = smov %s1223_s20  ;;  %s1769_s20 = smov %s1476_s17 }
 0x4aa   : > { %s1770_s22 = smov %s1239_s24  ;;  %24 = sbr.rel (!%p22_p1) target bundleno = 14 (0xe), region = 125 }
 0x4ae   : > { %s1771_s24 = smov %s1766_s12 }
 0x4b1   :  { %643 = vsyncpa [#allocation4], 1 }
 0x4b2   :  { %645 = vsyncpa [#allocation4 + $0x1], 1 }
 0x4b3   :  { %646 = vsyncpa [#allocation7], 1 }
 0x4b4   :  { %648 = vsyncpa [#allocation7 + $0x1], 1 }
 0x4b5   :  { %649 = vsyncpa [#allocation10], 1 }
 0x4b6   :  { %650 = vsyncpa [#allocation5], 1 }
 0x4b7   :  { %652 = vsyncpa [#allocation5 + $0x1], 1 }

</bundles_post_ra>
